<compile_context>
chip_gen: v6e
topology: v6e:2x2x1
jax: 0.10.0
libtpu: 0.0.40
codegen_flags: <defaults>
</compile_context>

<pallas_src>
import numpy as np

import jax
import jax.numpy as jnp
from jax import lax
from jax.experimental import pallas as pl
from jax.experimental.pallas import tpu as pltpu

NEG_SLOPE = 0.2    # LeakyReLU(0.2)
BN_EPS = 0.8       # nn.BatchNorm2d(out_filters, 0.8): 2nd positional arg is eps
LANE = 128         # lane-dense head output width (sliced back to 1 in the wrapper)


# --------------------------------- fused kernel --------------------------------- #

def _make_fused_kernel(num_layers, h4):
    """Whole DCDiscriminator forward in one kernel (see module docstring for the math)."""

    def kernel(*refs):
        y_ref = refs[0]
        conv_refs = refs[1:1 + 3 * num_layers]
        sh_ref, fw_ref, fb_ref, o_ref = refs[1 + 3 * num_layers:]

        y = y_ref[...]                                        # (B*H, W*Cin) bf16
        for l in range(num_layers):
            s_ref, q_ref, a_ref = conv_refs[3 * l:3 * l + 3]
            acc = None
            for kh in range(3):                               # 3 H-taps, all MXU work
                rows = jnp.dot(s_ref[kh], y,                  # 0/1 row gather -> exact
                               preferred_element_type=jnp.float32)
                part = jnp.dot(rows.astype(jnp.bfloat16), q_ref[kh],
                               preferred_element_type=jnp.float32)
                acc = part if acc is None else acc + part
            z = acc + a_ref[0:1, :]                           # conv bias        (f32)
            z = jnp.where(z >= 0.0, z, NEG_SLOPE * z)         # LeakyReLU(0.2)   (f32)
            # TODO(synk): Dropout2d(0.25) is stochastic in train mode only; eval identity here.
            z = z * a_ref[1:2, :] + a_ref[2:3, :]             # folded eval BatchNorm2d
            y = z.astype(jnp.bfloat16)                        # next layer's (B*Ho, Wo*Cout)

        # adv_layer: Linear(256*ds^2 -> 1) + Sigmoid, padded to 128 lanes (unmasked store).
        zacc = None
        for h in range(h4):
            rows = jnp.dot(sh_ref[h], y, preferred_element_type=jnp.float32)
            part = jnp.dot(rows.astype(jnp.bfloat16), fw_ref[h],
                           preferred_element_type=jnp.float32)
            zacc = part if zacc is None else zacc + part
        z = zacc + fb_ref[...]
        o_ref[...] = pl.reciprocal(1.0 + jnp.exp(-z), approx=True)   # exp + rcp on the EUP

    return kernel


def _vmem():
    return pl.BlockSpec(memory_space=pltpu.MemorySpace.VMEM)


def dc_discriminator_forward(img_nchw, plan):
    """Matches DCDiscriminator.forward (eval mode) on NCHW float32 input."""
    B, C, H, W = img_nchw.shape
    # Only the tiny network input crosses HBM: NCHW -> (B*H, W*C) bf16 row-major matrix.
    y0 = jnp.transpose(img_nchw, (0, 2, 3, 1)).reshape(B * H, W * C).astype(jnp.bfloat16)

    args = [y0]
    for s, q, aff in plan["layers"]:
        args += [s, q, aff]
    args += [plan["s_head"], plan["fw"], plan["fb"]]

    out = pl.pallas_call(
        _make_fused_kernel(len(plan["layers"]), plan["h4"]),
        out_shape=jax.ShapeDtypeStruct((B, LANE), jnp.float32),
        in_specs=[_vmem()] * len(args),
        out_specs=_vmem(),
    )(*args)
    return out[:, :1]    # lane-dense (B, 128) kernel output -> (B, 1)


# ------------------------- parameter -> kernel-operand packing ------------------------- #

def _row_gather_taps(batch, h_in, h_out):
    """(3, B*Ho, B*H) one-hot row gathers: tap kh selects input row 2*i + kh - 1 (0 = pad)."""
    s = np.zeros((3, batch * h_out, batch * h_in), np.float32)
    for kh in range(3):
        for b in range(batch):
            for i in range(h_out):
                h = 2 * i + kh - 1
                if 0 <= h < h_in:
                    s[kh, b * h_out + i, b * h_in + h] = 1.0
    return s


def _w_toeplitz_taps(w_hwio, w_in, w_out):
    """(3, W*Cin, Wo*Cout): per H-tap, the W taps + conv weights folded into one matmul."""
    _, _, cin, cout = w_hwio.shape
    q = np.zeros((3, w_in * cin, w_out * cout), np.float32)
    for kh in range(3):
        for j in range(w_out):
            for kw in range(3):
                w = 2 * j + kw - 1
                if 0 <= w < w_in:
                    q[kh, w * cin:(w + 1) * cin, j * cout:(j + 1) * cout] = w_hwio[kh, kw]
    return q


def build_plan(params, batch, image_size, image_channels):
    """Pack module parameters into the fused kernel's VMEM-resident operands."""
    H = W = image_size
    C = image_channels
    layers = []
    for blk in params["blocks"]:
        w = np.asarray(blk["w"], np.float32)              # (3, 3, Cin, Cout) HWIO
        D = w.shape[-1]
        Ho, Wo = H // 2, W // 2
        s = _row_gather_taps(batch, H, Ho)
        q = _w_toeplitz_taps(w, W, Wo)
        # bias / BN-scale / BN-shift packed into one operand, pre-tiled to the (w, c) layout.
        aff = np.stack([np.tile(np.asarray(blk["b"], np.float32), Wo),
                        np.tile(np.asarray(blk["scale"], np.float32), Wo),
                        np.tile(np.asarray(blk["shift"], np.float32), Wo)])
        layers.append((jnp.asarray(s, dtype=jnp.bfloat16),
                       jnp.asarray(q, dtype=jnp.bfloat16),
                       jnp.asarray(aff, dtype=jnp.float32)))
        H, W, C = Ho, Wo, D

    # Head: fold the PyTorch NCHW `out.view(B, -1)` flatten order into the FC weight (free
    # at init) and pad the single output unit to 128 lanes for an unmasked store.
    h4, w4, c4 = H, W, C
    s_head = np.zeros((h4, batch, batch * h4), np.float32)
    for h in range(h4):
        for b in range(batch):
            s_head[h, b, b * h4 + h] = 1.0
    fc_w = np.asarray(params["fc_w"], np.float32).reshape(c4, h4, w4)   # rows are (c, h, w)
    fc_w_nhwc = np.transpose(fc_w, (1, 2, 0)).reshape(h4, w4 * c4)      # -> (h, (w, c))
    fw = np.zeros((h4, w4 * c4, LANE), np.float32)
    fw[:, :, 0] = fc_w_nhwc
    fb = np.full((1, LANE), float(np.asarray(params["fc_b"])[0]), np.float32)

    return dict(layers=layers,
                s_head=jnp.asarray(s_head, dtype=jnp.bfloat16),
                fw=jnp.asarray(fw, dtype=jnp.bfloat16),
                fb=jnp.asarray(fb, dtype=jnp.float32),
                h4=h4)


# ----------------------------------- module params ----------------------------------- #

def init_params(key, image_channels, image_size):
    channels = [image_channels, 32, 64, 128, 256]
    keys = jax.random.split(key, 2 * 4 + 2)
    blocks = []
    for i in range(4):
        cin, cout = channels[i], channels[i + 1]
        w = jax.random.normal(keys[2 * i], (3, 3, cin, cout), jnp.float32) * 0.1
        b = jax.random.normal(keys[2 * i + 1], (cout,), jnp.float32) * 0.05
        if i == 0:
            scale = jnp.ones((cout,), jnp.float32)     # first block: bn=False
            shift = jnp.zeros((cout,), jnp.float32)
        else:
            # PyTorch BatchNorm2d defaults (eval): gamma=1, beta=0, running_mean=0, running_var=1.
            gamma = jnp.ones((cout,), jnp.float32)
            beta = jnp.zeros((cout,), jnp.float32)
            running_mean = jnp.zeros((cout,), jnp.float32)
            running_var = jnp.ones((cout,), jnp.float32)
            scale = gamma / jnp.sqrt(running_var + BN_EPS)
            shift = beta - running_mean * scale
        blocks.append(dict(w=w, b=b, scale=scale, shift=shift))
    ds = image_size // (2 ** 4)
    fc_w = jax.random.normal(keys[8], (256 * ds * ds, 1), jnp.float32) * 0.05
    fc_b = jax.random.normal(keys[9], (1,), jnp.float32) * 0.05
    return dict(blocks=blocks, fc_w=fc_w, fc_b=fc_b)


# ---------------------------------- pure-JAX reference ---------------------------------- #

def reference_forward(img_nchw, params, mxu_dtype=jnp.float32):
    """Reference forward.  mxu_dtype=bfloat16 mirrors the kernel's MXU numerics exactly."""
    prec = lax.Precision.HIGHEST if mxu_dtype == jnp.float32 else lax.Precision.DEFAULT
    x = jnp.transpose(img_nchw, (0, 2, 3, 1))
    for blk in params["blocks"]:
        y = lax.conv_general_dilated(
            x.astype(mxu_dtype), blk["w"].astype(mxu_dtype),
            window_strides=(2, 2), padding=((1, 1), (1, 1)),
            dimension_numbers=("NHWC", "HWIO", "NHWC"),
            precision=prec, preferred_element_type=jnp.float32)
        y = y + blk["b"]
        y = jnp.where(y >= 0.0, y, NEG_SLOPE * y)
        x = y * blk["scale"] + blk["shift"]
    flat = jnp.transpose(x, (0, 3, 1, 2)).reshape(x.shape[0], -1)   # NCHW .view(B, -1)
    z = jnp.dot(flat.astype(mxu_dtype), params["fc_w"].astype(mxu_dtype),
                precision=prec, preferred_element_type=jnp.float32) + params["fc_b"]
    return jax.nn.sigmoid(z)


# ---------------------------------------- main ---------------------------------------- #

if __name__ == "__main__":
    batch, image_channels, image_size = 2, 4, 16   # ds_size = 16 // 2**4 = 1
    key = jax.random.PRNGKey(0)
    k_img, k_par = jax.random.split(key)
    img = jax.random.normal(
        k_img, (batch, image_channels, image_size, image_size), jnp.float32)
    params = init_params(k_par, image_channels, image_size)
    plan = build_plan(params, batch, image_size, image_channels)

    validity = jax.block_until_ready(dc_discriminator_forward(img, plan))
    ref_bf16 = jax.block_until_ready(reference_forward(img, params, mxu_dtype=jnp.bfloat16))
    ref_f32 = jax.block_until_ready(reference_forward(img, params, mxu_dtype=jnp.float32))

    assert validity.shape == (batch, 1), validity.shape
    # Tight check vs. a reference that uses the same bf16-in / f32-accumulate MXU numerics.
    if not bool(jnp.allclose(validity, ref_bf16, rtol=5e-3, atol=5e-3)):
        raise AssertionError(f"mismatch vs bf16-matmul reference:\n{validity}\n{ref_bf16}")
    # Semantic check vs. the full-f32 module forward (bf16 MXU inputs cost ~1e-3 here).
    if not bool(jnp.allclose(validity, ref_f32, rtol=5e-2, atol=5e-2)):
        raise AssertionError(f"mismatch vs f32 reference:\n{validity}\n{ref_f32}")
    print("KERNEL_OK")
</pallas_src>

<mosaic_0001>
module attributes {stable_mosaic.version = 11 : i64} {
  func.func @kernel(%arg0: memref<32x64xbf16, #tpu.memory_space<vmem>>, %arg1: memref<3x16x32xbf16, #tpu.memory_space<vmem>>, %arg2: memref<3x64x256xbf16, #tpu.memory_space<vmem>>, %arg3: memref<3x256xf32, #tpu.memory_space<vmem>>, %arg4: memref<3x8x16xbf16, #tpu.memory_space<vmem>>, %arg5: memref<3x256x256xbf16, #tpu.memory_space<vmem>>, %arg6: memref<3x256xf32, #tpu.memory_space<vmem>>, %arg7: memref<3x4x8xbf16, #tpu.memory_space<vmem>>, %arg8: memref<3x256x256xbf16, #tpu.memory_space<vmem>>, %arg9: memref<3x256xf32, #tpu.memory_space<vmem>>, %arg10: memref<3x2x4xbf16, #tpu.memory_space<vmem>>, %arg11: memref<3x256x256xbf16, #tpu.memory_space<vmem>>, %arg12: memref<3x256xf32, #tpu.memory_space<vmem>>, %arg13: memref<1x2x2xbf16, #tpu.memory_space<vmem>>, %arg14: memref<1x256x128xbf16, #tpu.memory_space<vmem>>, %arg15: memref<1x128xf32, #tpu.memory_space<vmem>>, %arg16: memref<2x128xf32, #tpu.memory_space<vmem>>) attributes {dimension_semantics = [], scalar_prefetch = 0 : i64, scratch_operands = 0 : i64, tpu.core_type = #tpu.core_type<tc>} {
    %c0 = arith.constant 0 : index
    %c0_0 = arith.constant 0 : index
    %0 = vector.load %arg0[%c0, %c0_0] : memref<32x64xbf16, #tpu.memory_space<vmem>>, vector<32x64xbf16>
    %c0_1 = arith.constant 0 : index
    %c0_2 = arith.constant 0 : index
    %c0_3 = arith.constant 0 : index
    %1 = vector.load %arg1[%c0_1, %c0_2, %c0_3] : memref<3x16x32xbf16, #tpu.memory_space<vmem>>, vector<1x16x32xbf16>
    %2 = vector.shape_cast %1 : vector<1x16x32xbf16> to vector<16x32xbf16>
    %cst = arith.constant dense<0.000000e+00> : vector<16x64xf32>
    %3 = tpu.matmul %2, %0, %cst {dimension_numbers = #tpu.dot_dimension_numbers<[1], [0], [0], [1], [0, 0, 1, 1], [], []>} : vector<16x32xbf16>, vector<32x64xbf16>, vector<16x64xf32> -> vector<16x64xf32>
    %4 = arith.truncf %3 : vector<16x64xf32> to vector<16x64xbf16>
    %c0_4 = arith.constant 0 : index
    %c0_5 = arith.constant 0 : index
    %c0_6 = arith.constant 0 : index
    %5 = vector.load %arg2[%c0_4, %c0_5, %c0_6] : memref<3x64x256xbf16, #tpu.memory_space<vmem>>, vector<1x64x256xbf16>
    %6 = vector.shape_cast %5 : vector<1x64x256xbf16> to vector<64x256xbf16>
    %cst_7 = arith.constant dense<0.000000e+00> : vector<16x256xf32>
    %7 = tpu.matmul %4, %6, %cst_7 {dimension_numbers = #tpu.dot_dimension_numbers<[1], [0], [0], [1], [0, 0, 1, 1], [], []>} : vector<16x64xbf16>, vector<64x256xbf16>, vector<16x256xf32> -> vector<16x256xf32>
    %c1 = arith.constant 1 : index
    %c0_8 = arith.constant 0 : index
    %c0_9 = arith.constant 0 : index
    %8 = vector.load %arg1[%c1, %c0_8, %c0_9] : memref<3x16x32xbf16, #tpu.memory_space<vmem>>, vector<1x16x32xbf16>
    %9 = vector.shape_cast %8 : vector<1x16x32xbf16> to vector<16x32xbf16>
    %cst_10 = arith.constant dense<0.000000e+00> : vector<16x64xf32>
    %10 = tpu.matmul %9, %0, %cst_10 {dimension_numbers = #tpu.dot_dimension_numbers<[1], [0], [0], [1], [0, 0, 1, 1], [], []>} : vector<16x32xbf16>, vector<32x64xbf16>, vector<16x64xf32> -> vector<16x64xf32>
    %11 = arith.truncf %10 : vector<16x64xf32> to vector<16x64xbf16>
    %c1_11 = arith.constant 1 : index
    %c0_12 = arith.constant 0 : index
    %c0_13 = arith.constant 0 : index
    %12 = vector.load %arg2[%c1_11, %c0_12, %c0_13] : memref<3x64x256xbf16, #tpu.memory_space<vmem>>, vector<1x64x256xbf16>
    %13 = vector.shape_cast %12 : vector<1x64x256xbf16> to vector<64x256xbf16>
    %cst_14 = arith.constant dense<0.000000e+00> : vector<16x256xf32>
    %14 = tpu.matmul %11, %13, %cst_14 {dimension_numbers = #tpu.dot_dimension_numbers<[1], [0], [0], [1], [0, 0, 1, 1], [], []>} : vector<16x64xbf16>, vector<64x256xbf16>, vector<16x256xf32> -> vector<16x256xf32>
    %15 = arith.addf %7, %14 : vector<16x256xf32>
    %c2 = arith.constant 2 : index
    %c0_15 = arith.constant 0 : index
    %c0_16 = arith.constant 0 : index
    %16 = vector.load %arg1[%c2, %c0_15, %c0_16] : memref<3x16x32xbf16, #tpu.memory_space<vmem>>, vector<1x16x32xbf16>
    %17 = vector.shape_cast %16 : vector<1x16x32xbf16> to vector<16x32xbf16>
    %cst_17 = arith.constant dense<0.000000e+00> : vector<16x64xf32>
    %18 = tpu.matmul %17, %0, %cst_17 {dimension_numbers = #tpu.dot_dimension_numbers<[1], [0], [0], [1], [0, 0, 1, 1], [], []>} : vector<16x32xbf16>, vector<32x64xbf16>, vector<16x64xf32> -> vector<16x64xf32>
    %19 = arith.truncf %18 : vector<16x64xf32> to vector<16x64xbf16>
    %c2_18 = arith.constant 2 : index
    %c0_19 = arith.constant 0 : index
    %c0_20 = arith.constant 0 : index
    %20 = vector.load %arg2[%c2_18, %c0_19, %c0_20] : memref<3x64x256xbf16, #tpu.memory_space<vmem>>, vector<1x64x256xbf16>
    %21 = vector.shape_cast %20 : vector<1x64x256xbf16> to vector<64x256xbf16>
    %cst_21 = arith.constant dense<0.000000e+00> : vector<16x256xf32>
    %22 = tpu.matmul %19, %21, %cst_21 {dimension_numbers = #tpu.dot_dimension_numbers<[1], [0], [0], [1], [0, 0, 1, 1], [], []>} : vector<16x64xbf16>, vector<64x256xbf16>, vector<16x256xf32> -> vector<16x256xf32>
    %23 = arith.addf %15, %22 : vector<16x256xf32>
    %c0_22 = arith.constant 0 : index
    %c0_23 = arith.constant 0 : index
    %24 = vector.load %arg3[%c0_22, %c0_23] : memref<3x256xf32, #tpu.memory_space<vmem>>, vector<1x256xf32>
    %25 = vector.broadcast %24 : vector<1x256xf32> to vector<16x256xf32>
    %26 = arith.addf %23, %25 : vector<16x256xf32>
    %cst_24 = arith.constant 0.000000e+00 : f32
    %27 = vector.broadcast %cst_24 : f32 to vector<16x256xf32>
    %28 = arith.cmpf oge, %26, %27 : vector<16x256xf32>
    %cst_25 = arith.constant 2.000000e-01 : f32
    %29 = vector.broadcast %cst_25 : f32 to vector<16x256xf32>
    %30 = arith.mulf %29, %26 : vector<16x256xf32>
    %31 = arith.select %28, %26, %30 : vector<16x256xi1>, vector<16x256xf32>
    %c1_26 = arith.constant 1 : index
    %c0_27 = arith.constant 0 : index
    %32 = vector.load %arg3[%c1_26, %c0_27] : memref<3x256xf32, #tpu.memory_space<vmem>>, vector<1x256xf32>
    %33 = vector.broadcast %32 : vector<1x256xf32> to vector<16x256xf32>
    %34 = arith.mulf %31, %33 : vector<16x256xf32>
    %c2_28 = arith.constant 2 : index
    %c0_29 = arith.constant 0 : index
    %35 = vector.load %arg3[%c2_28, %c0_29] : memref<3x256xf32, #tpu.memory_space<vmem>>, vector<1x256xf32>
    %36 = vector.broadcast %35 : vector<1x256xf32> to vector<16x256xf32>
    %37 = arith.addf %34, %36 : vector<16x256xf32>
    %38 = arith.truncf %37 : vector<16x256xf32> to vector<16x256xbf16>
    %c0_30 = arith.constant 0 : index
    %c0_31 = arith.constant 0 : index
    %c0_32 = arith.constant 0 : index
    %39 = vector.load %arg4[%c0_30, %c0_31, %c0_32] : memref<3x8x16xbf16, #tpu.memory_space<vmem>>, vector<1x8x16xbf16>
    %40 = vector.shape_cast %39 : vector<1x8x16xbf16> to vector<8x16xbf16>
    %cst_33 = arith.constant dense<0.000000e+00> : vector<8x256xf32>
    %41 = tpu.matmul %40, %38, %cst_33 {dimension_numbers = #tpu.dot_dimension_numbers<[1], [0], [0], [1], [0, 0, 1, 1], [], []>} : vector<8x16xbf16>, vector<16x256xbf16>, vector<8x256xf32> -> vector<8x256xf32>
    %42 = arith.truncf %41 : vector<8x256xf32> to vector<8x256xbf16>
    %c0_34 = arith.constant 0 : index
    %c0_35 = arith.constant 0 : index
    %c0_36 = arith.constant 0 : index
    %43 = vector.load %arg5[%c0_34, %c0_35, %c0_36] : memref<3x256x256xbf16, #tpu.memory_space<vmem>>, vector<1x256x256xbf16>
    %44 = vector.shape_cast %43 : vector<1x256x256xbf16> to vector<256x256xbf16>
    %cst_37 = arith.constant dense<0.000000e+00> : vector<8x256xf32>
    %45 = tpu.matmul %42, %44, %cst_37 {dimension_numbers = #tpu.dot_dimension_numbers<[1], [0], [0], [1], [0, 0, 1, 1], [], []>} : vector<8x256xbf16>, vector<256x256xbf16>, vector<8x256xf32> -> vector<8x256xf32>
    %c1_38 = arith.constant 1 : index
    %c0_39 = arith.constant 0 : index
    %c0_40 = arith.constant 0 : index
    %46 = vector.load %arg4[%c1_38, %c0_39, %c0_40] : memref<3x8x16xbf16, #tpu.memory_space<vmem>>, vector<1x8x16xbf16>
    %47 = vector.shape_cast %46 : vector<1x8x16xbf16> to vector<8x16xbf16>
    %cst_41 = arith.constant dense<0.000000e+00> : vector<8x256xf32>
    %48 = tpu.matmul %47, %38, %cst_41 {dimension_numbers = #tpu.dot_dimension_numbers<[1], [0], [0], [1], [0, 0, 1, 1], [], []>} : vector<8x16xbf16>, vector<16x256xbf16>, vector<8x256xf32> -> vector<8x256xf32>
    %49 = arith.truncf %48 : vector<8x256xf32> to vector<8x256xbf16>
    %c1_42 = arith.constant 1 : index
    %c0_43 = arith.constant 0 : index
    %c0_44 = arith.constant 0 : index
    %50 = vector.load %arg5[%c1_42, %c0_43, %c0_44] : memref<3x256x256xbf16, #tpu.memory_space<vmem>>, vector<1x256x256xbf16>
    %51 = vector.shape_cast %50 : vector<1x256x256xbf16> to vector<256x256xbf16>
    %cst_45 = arith.constant dense<0.000000e+00> : vector<8x256xf32>
    %52 = tpu.matmul %49, %51, %cst_45 {dimension_numbers = #tpu.dot_dimension_numbers<[1], [0], [0], [1], [0, 0, 1, 1], [], []>} : vector<8x256xbf16>, vector<256x256xbf16>, vector<8x256xf32> -> vector<8x256xf32>
    %53 = arith.addf %45, %52 : vector<8x256xf32>
    %c2_46 = arith.constant 2 : index
    %c0_47 = arith.constant 0 : index
    %c0_48 = arith.constant 0 : index
    %54 = vector.load %arg4[%c2_46, %c0_47, %c0_48] : memref<3x8x16xbf16, #tpu.memory_space<vmem>>, vector<1x8x16xbf16>
    %55 = vector.shape_cast %54 : vector<1x8x16xbf16> to vector<8x16xbf16>
    %cst_49 = arith.constant dense<0.000000e+00> : vector<8x256xf32>
    %56 = tpu.matmul %55, %38, %cst_49 {dimension_numbers = #tpu.dot_dimension_numbers<[1], [0], [0], [1], [0, 0, 1, 1], [], []>} : vector<8x16xbf16>, vector<16x256xbf16>, vector<8x256xf32> -> vector<8x256xf32>
    %57 = arith.truncf %56 : vector<8x256xf32> to vector<8x256xbf16>
    %c2_50 = arith.constant 2 : index
    %c0_51 = arith.constant 0 : index
    %c0_52 = arith.constant 0 : index
    %58 = vector.load %arg5[%c2_50, %c0_51, %c0_52] : memref<3x256x256xbf16, #tpu.memory_space<vmem>>, vector<1x256x256xbf16>
    %59 = vector.shape_cast %58 : vector<1x256x256xbf16> to vector<256x256xbf16>
    %cst_53 = arith.constant dense<0.000000e+00> : vector<8x256xf32>
    %60 = tpu.matmul %57, %59, %cst_53 {dimension_numbers = #tpu.dot_dimension_numbers<[1], [0], [0], [1], [0, 0, 1, 1], [], []>} : vector<8x256xbf16>, vector<256x256xbf16>, vector<8x256xf32> -> vector<8x256xf32>
    %61 = arith.addf %53, %60 : vector<8x256xf32>
    %c0_54 = arith.constant 0 : index
    %c0_55 = arith.constant 0 : index
    %62 = vector.load %arg6[%c0_54, %c0_55] : memref<3x256xf32, #tpu.memory_space<vmem>>, vector<1x256xf32>
    %63 = vector.broadcast %62 : vector<1x256xf32> to vector<8x256xf32>
    %64 = arith.addf %61, %63 : vector<8x256xf32>
    %cst_56 = arith.constant 0.000000e+00 : f32
    %65 = vector.broadcast %cst_56 : f32 to vector<8x256xf32>
    %66 = arith.cmpf oge, %64, %65 : vector<8x256xf32>
    %cst_57 = arith.constant 2.000000e-01 : f32
    %67 = vector.broadcast %cst_57 : f32 to vector<8x256xf32>
    %68 = arith.mulf %67, %64 : vector<8x256xf32>
    %69 = arith.select %66, %64, %68 : vector<8x256xi1>, vector<8x256xf32>
    %c1_58 = arith.constant 1 : index
    %c0_59 = arith.constant 0 : index
    %70 = vector.load %arg6[%c1_58, %c0_59] : memref<3x256xf32, #tpu.memory_space<vmem>>, vector<1x256xf32>
    %71 = vector.broadcast %70 : vector<1x256xf32> to vector<8x256xf32>
    %72 = arith.mulf %69, %71 : vector<8x256xf32>
    %c2_60 = arith.constant 2 : index
    %c0_61 = arith.constant 0 : index
    %73 = vector.load %arg6[%c2_60, %c0_61] : memref<3x256xf32, #tpu.memory_space<vmem>>, vector<1x256xf32>
    %74 = vector.broadcast %73 : vector<1x256xf32> to vector<8x256xf32>
    %75 = arith.addf %72, %74 : vector<8x256xf32>
    %76 = arith.truncf %75 : vector<8x256xf32> to vector<8x256xbf16>
    %c0_62 = arith.constant 0 : index
    %c0_63 = arith.constant 0 : index
    %c0_64 = arith.constant 0 : index
    %77 = vector.load %arg7[%c0_62, %c0_63, %c0_64] : memref<3x4x8xbf16, #tpu.memory_space<vmem>>, vector<1x4x8xbf16>
    %78 = vector.shape_cast %77 : vector<1x4x8xbf16> to vector<4x8xbf16>
    %cst_65 = arith.constant dense<0.000000e+00> : vector<4x256xf32>
    %79 = tpu.matmul %78, %76, %cst_65 {dimension_numbers = #tpu.dot_dimension_numbers<[1], [0], [0], [1], [0, 0, 1, 1], [], []>} : vector<4x8xbf16>, vector<8x256xbf16>, vector<4x256xf32> -> vector<4x256xf32>
    %80 = arith.truncf %79 : vector<4x256xf32> to vector<4x256xbf16>
    %c0_66 = arith.constant 0 : index
    %c0_67 = arith.constant 0 : index
    %c0_68 = arith.constant 0 : index
    %81 = vector.load %arg8[%c0_66, %c0_67, %c0_68] : memref<3x256x256xbf16, #tpu.memory_space<vmem>>, vector<1x256x256xbf16>
    %82 = vector.shape_cast %81 : vector<1x256x256xbf16> to vector<256x256xbf16>
    %cst_69 = arith.constant dense<0.000000e+00> : vector<4x256xf32>
    %83 = tpu.matmul %80, %82, %cst_69 {dimension_numbers = #tpu.dot_dimension_numbers<[1], [0], [0], [1], [0, 0, 1, 1], [], []>} : vector<4x256xbf16>, vector<256x256xbf16>, vector<4x256xf32> -> vector<4x256xf32>
    %c1_70 = arith.constant 1 : index
    %c0_71 = arith.constant 0 : index
    %c0_72 = arith.constant 0 : index
    %84 = vector.load %arg7[%c1_70, %c0_71, %c0_72] : memref<3x4x8xbf16, #tpu.memory_space<vmem>>, vector<1x4x8xbf16>
    %85 = vector.shape_cast %84 : vector<1x4x8xbf16> to vector<4x8xbf16>
    %cst_73 = arith.constant dense<0.000000e+00> : vector<4x256xf32>
    %86 = tpu.matmul %85, %76, %cst_73 {dimension_numbers = #tpu.dot_dimension_numbers<[1], [0], [0], [1], [0, 0, 1, 1], [], []>} : vector<4x8xbf16>, vector<8x256xbf16>, vector<4x256xf32> -> vector<4x256xf32>
    %87 = arith.truncf %86 : vector<4x256xf32> to vector<4x256xbf16>
    %c1_74 = arith.constant 1 : index
    %c0_75 = arith.constant 0 : index
    %c0_76 = arith.constant 0 : index
    %88 = vector.load %arg8[%c1_74, %c0_75, %c0_76] : memref<3x256x256xbf16, #tpu.memory_space<vmem>>, vector<1x256x256xbf16>
    %89 = vector.shape_cast %88 : vector<1x256x256xbf16> to vector<256x256xbf16>
    %cst_77 = arith.constant dense<0.000000e+00> : vector<4x256xf32>
    %90 = tpu.matmul %87, %89, %cst_77 {dimension_numbers = #tpu.dot_dimension_numbers<[1], [0], [0], [1], [0, 0, 1, 1], [], []>} : vector<4x256xbf16>, vector<256x256xbf16>, vector<4x256xf32> -> vector<4x256xf32>
    %91 = arith.addf %83, %90 : vector<4x256xf32>
    %c2_78 = arith.constant 2 : index
    %c0_79 = arith.constant 0 : index
    %c0_80 = arith.constant 0 : index
    %92 = vector.load %arg7[%c2_78, %c0_79, %c0_80] : memref<3x4x8xbf16, #tpu.memory_space<vmem>>, vector<1x4x8xbf16>
    %93 = vector.shape_cast %92 : vector<1x4x8xbf16> to vector<4x8xbf16>
    %cst_81 = arith.constant dense<0.000000e+00> : vector<4x256xf32>
    %94 = tpu.matmul %93, %76, %cst_81 {dimension_numbers = #tpu.dot_dimension_numbers<[1], [0], [0], [1], [0, 0, 1, 1], [], []>} : vector<4x8xbf16>, vector<8x256xbf16>, vector<4x256xf32> -> vector<4x256xf32>
    %95 = arith.truncf %94 : vector<4x256xf32> to vector<4x256xbf16>
    %c2_82 = arith.constant 2 : index
    %c0_83 = arith.constant 0 : index
    %c0_84 = arith.constant 0 : index
    %96 = vector.load %arg8[%c2_82, %c0_83, %c0_84] : memref<3x256x256xbf16, #tpu.memory_space<vmem>>, vector<1x256x256xbf16>
    %97 = vector.shape_cast %96 : vector<1x256x256xbf16> to vector<256x256xbf16>
    %cst_85 = arith.constant dense<0.000000e+00> : vector<4x256xf32>
    %98 = tpu.matmul %95, %97, %cst_85 {dimension_numbers = #tpu.dot_dimension_numbers<[1], [0], [0], [1], [0, 0, 1, 1], [], []>} : vector<4x256xbf16>, vector<256x256xbf16>, vector<4x256xf32> -> vector<4x256xf32>
    %99 = arith.addf %91, %98 : vector<4x256xf32>
    %c0_86 = arith.constant 0 : index
    %c0_87 = arith.constant 0 : index
    %100 = vector.load %arg9[%c0_86, %c0_87] : memref<3x256xf32, #tpu.memory_space<vmem>>, vector<1x256xf32>
    %101 = vector.broadcast %100 : vector<1x256xf32> to vector<4x256xf32>
    %102 = arith.addf %99, %101 : vector<4x256xf32>
    %cst_88 = arith.constant 0.000000e+00 : f32
    %103 = vector.broadcast %cst_88 : f32 to vector<4x256xf32>
    %104 = arith.cmpf oge, %102, %103 : vector<4x256xf32>
    %cst_89 = arith.constant 2.000000e-01 : f32
    %105 = vector.broadcast %cst_89 : f32 to vector<4x256xf32>
    %106 = arith.mulf %105, %102 : vector<4x256xf32>
    %107 = arith.select %104, %102, %106 : vector<4x256xi1>, vector<4x256xf32>
    %c1_90 = arith.constant 1 : index
    %c0_91 = arith.constant 0 : index
    %108 = vector.load %arg9[%c1_90, %c0_91] : memref<3x256xf32, #tpu.memory_space<vmem>>, vector<1x256xf32>
    %109 = vector.broadcast %108 : vector<1x256xf32> to vector<4x256xf32>
    %110 = arith.mulf %107, %109 : vector<4x256xf32>
    %c2_92 = arith.constant 2 : index
    %c0_93 = arith.constant 0 : index
    %111 = vector.load %arg9[%c2_92, %c0_93] : memref<3x256xf32, #tpu.memory_space<vmem>>, vector<1x256xf32>
    %112 = vector.broadcast %111 : vector<1x256xf32> to vector<4x256xf32>
    %113 = arith.addf %110, %112 : vector<4x256xf32>
    %114 = arith.truncf %113 : vector<4x256xf32> to vector<4x256xbf16>
    %c0_94 = arith.constant 0 : index
    %c0_95 = arith.constant 0 : index
    %c0_96 = arith.constant 0 : index
    %115 = vector.load %arg10[%c0_94, %c0_95, %c0_96] : memref<3x2x4xbf16, #tpu.memory_space<vmem>>, vector<1x2x4xbf16>
    %116 = vector.shape_cast %115 : vector<1x2x4xbf16> to vector<2x4xbf16>
    %cst_97 = arith.constant dense<0.000000e+00> : vector<2x256xf32>
    %117 = tpu.matmul %116, %114, %cst_97 {dimension_numbers = #tpu.dot_dimension_numbers<[1], [0], [0], [1], [0, 0, 1, 1], [], []>} : vector<2x4xbf16>, vector<4x256xbf16>, vector<2x256xf32> -> vector<2x256xf32>
    %118 = arith.truncf %117 : vector<2x256xf32> to vector<2x256xbf16>
    %c0_98 = arith.constant 0 : index
    %c0_99 = arith.constant 0 : index
    %c0_100 = arith.constant 0 : index
    %119 = vector.load %arg11[%c0_98, %c0_99, %c0_100] : memref<3x256x256xbf16, #tpu.memory_space<vmem>>, vector<1x256x256xbf16>
    %120 = vector.shape_cast %119 : vector<1x256x256xbf16> to vector<256x256xbf16>
    %cst_101 = arith.constant dense<0.000000e+00> : vector<2x256xf32>
    %121 = tpu.matmul %118, %120, %cst_101 {dimension_numbers = #tpu.dot_dimension_numbers<[1], [0], [0], [1], [0, 0, 1, 1], [], []>} : vector<2x256xbf16>, vector<256x256xbf16>, vector<2x256xf32> -> vector<2x256xf32>
    %c1_102 = arith.constant 1 : index
    %c0_103 = arith.constant 0 : index
    %c0_104 = arith.constant 0 : index
    %122 = vector.load %arg10[%c1_102, %c0_103, %c0_104] : memref<3x2x4xbf16, #tpu.memory_space<vmem>>, vector<1x2x4xbf16>
    %123 = vector.shape_cast %122 : vector<1x2x4xbf16> to vector<2x4xbf16>
    %cst_105 = arith.constant dense<0.000000e+00> : vector<2x256xf32>
    %124 = tpu.matmul %123, %114, %cst_105 {dimension_numbers = #tpu.dot_dimension_numbers<[1], [0], [0], [1], [0, 0, 1, 1], [], []>} : vector<2x4xbf16>, vector<4x256xbf16>, vector<2x256xf32> -> vector<2x256xf32>
    %125 = arith.truncf %124 : vector<2x256xf32> to vector<2x256xbf16>
    %c1_106 = arith.constant 1 : index
    %c0_107 = arith.constant 0 : index
    %c0_108 = arith.constant 0 : index
    %126 = vector.load %arg11[%c1_106, %c0_107, %c0_108] : memref<3x256x256xbf16, #tpu.memory_space<vmem>>, vector<1x256x256xbf16>
    %127 = vector.shape_cast %126 : vector<1x256x256xbf16> to vector<256x256xbf16>
    %cst_109 = arith.constant dense<0.000000e+00> : vector<2x256xf32>
    %128 = tpu.matmul %125, %127, %cst_109 {dimension_numbers = #tpu.dot_dimension_numbers<[1], [0], [0], [1], [0, 0, 1, 1], [], []>} : vector<2x256xbf16>, vector<256x256xbf16>, vector<2x256xf32> -> vector<2x256xf32>
    %129 = arith.addf %121, %128 : vector<2x256xf32>
    %c2_110 = arith.constant 2 : index
    %c0_111 = arith.constant 0 : index
    %c0_112 = arith.constant 0 : index
    %130 = vector.load %arg10[%c2_110, %c0_111, %c0_112] : memref<3x2x4xbf16, #tpu.memory_space<vmem>>, vector<1x2x4xbf16>
    %131 = vector.shape_cast %130 : vector<1x2x4xbf16> to vector<2x4xbf16>
    %cst_113 = arith.constant dense<0.000000e+00> : vector<2x256xf32>
    %132 = tpu.matmul %131, %114, %cst_113 {dimension_numbers = #tpu.dot_dimension_numbers<[1], [0], [0], [1], [0, 0, 1, 1], [], []>} : vector<2x4xbf16>, vector<4x256xbf16>, vector<2x256xf32> -> vector<2x256xf32>
    %133 = arith.truncf %132 : vector<2x256xf32> to vector<2x256xbf16>
    %c2_114 = arith.constant 2 : index
    %c0_115 = arith.constant 0 : index
    %c0_116 = arith.constant 0 : index
    %134 = vector.load %arg11[%c2_114, %c0_115, %c0_116] : memref<3x256x256xbf16, #tpu.memory_space<vmem>>, vector<1x256x256xbf16>
    %135 = vector.shape_cast %134 : vector<1x256x256xbf16> to vector<256x256xbf16>
    %cst_117 = arith.constant dense<0.000000e+00> : vector<2x256xf32>
    %136 = tpu.matmul %133, %135, %cst_117 {dimension_numbers = #tpu.dot_dimension_numbers<[1], [0], [0], [1], [0, 0, 1, 1], [], []>} : vector<2x256xbf16>, vector<256x256xbf16>, vector<2x256xf32> -> vector<2x256xf32>
    %137 = arith.addf %129, %136 : vector<2x256xf32>
    %c0_118 = arith.constant 0 : index
    %c0_119 = arith.constant 0 : index
    %138 = vector.load %arg12[%c0_118, %c0_119] : memref<3x256xf32, #tpu.memory_space<vmem>>, vector<1x256xf32>
    %139 = vector.broadcast %138 : vector<1x256xf32> to vector<2x256xf32>
    %140 = arith.addf %137, %139 : vector<2x256xf32>
    %cst_120 = arith.constant 0.000000e+00 : f32
    %141 = vector.broadcast %cst_120 : f32 to vector<2x256xf32>
    %142 = arith.cmpf oge, %140, %141 : vector<2x256xf32>
    %cst_121 = arith.constant 2.000000e-01 : f32
    %143 = vector.broadcast %cst_121 : f32 to vector<2x256xf32>
    %144 = arith.mulf %143, %140 : vector<2x256xf32>
    %145 = arith.select %142, %140, %144 : vector<2x256xi1>, vector<2x256xf32>
    %c1_122 = arith.constant 1 : index
    %c0_123 = arith.constant 0 : index
    %146 = vector.load %arg12[%c1_122, %c0_123] : memref<3x256xf32, #tpu.memory_space<vmem>>, vector<1x256xf32>
    %147 = vector.broadcast %146 : vector<1x256xf32> to vector<2x256xf32>
    %148 = arith.mulf %145, %147 : vector<2x256xf32>
    %c2_124 = arith.constant 2 : index
    %c0_125 = arith.constant 0 : index
    %149 = vector.load %arg12[%c2_124, %c0_125] : memref<3x256xf32, #tpu.memory_space<vmem>>, vector<1x256xf32>
    %150 = vector.broadcast %149 : vector<1x256xf32> to vector<2x256xf32>
    %151 = arith.addf %148, %150 : vector<2x256xf32>
    %152 = arith.truncf %151 : vector<2x256xf32> to vector<2x256xbf16>
    %c0_126 = arith.constant 0 : index
    %c0_127 = arith.constant 0 : index
    %c0_128 = arith.constant 0 : index
    %153 = vector.load %arg13[%c0_126, %c0_127, %c0_128] : memref<1x2x2xbf16, #tpu.memory_space<vmem>>, vector<1x2x2xbf16>
    %154 = vector.shape_cast %153 : vector<1x2x2xbf16> to vector<2x2xbf16>
    %cst_129 = arith.constant dense<0.000000e+00> : vector<2x256xf32>
    %155 = tpu.matmul %154, %152, %cst_129 {dimension_numbers = #tpu.dot_dimension_numbers<[1], [0], [0], [1], [0, 0, 1, 1], [], []>} : vector<2x2xbf16>, vector<2x256xbf16>, vector<2x256xf32> -> vector<2x256xf32>
    %156 = arith.truncf %155 : vector<2x256xf32> to vector<2x256xbf16>
    %c0_130 = arith.constant 0 : index
    %c0_131 = arith.constant 0 : index
    %c0_132 = arith.constant 0 : index
    %157 = vector.load %arg14[%c0_130, %c0_131, %c0_132] : memref<1x256x128xbf16, #tpu.memory_space<vmem>>, vector<1x256x128xbf16>
    %158 = vector.shape_cast %157 : vector<1x256x128xbf16> to vector<256x128xbf16>
    %cst_133 = arith.constant dense<0.000000e+00> : vector<2x128xf32>
    %159 = tpu.matmul %156, %158, %cst_133 {dimension_numbers = #tpu.dot_dimension_numbers<[1], [0], [0], [1], [0, 0, 1, 1], [], []>} : vector<2x256xbf16>, vector<256x128xbf16>, vector<2x128xf32> -> vector<2x128xf32>
    %c0_134 = arith.constant 0 : index
    %c0_135 = arith.constant 0 : index
    %160 = vector.load %arg15[%c0_134, %c0_135] : memref<1x128xf32, #tpu.memory_space<vmem>>, vector<1x128xf32>
    %161 = vector.broadcast %160 : vector<1x128xf32> to vector<2x128xf32>
    %162 = arith.addf %159, %161 : vector<2x128xf32>
    %cst_136 = arith.constant 0.000000e+00 : f32
    %163 = vector.broadcast %cst_136 : f32 to vector<2x128xf32>
    %164 = arith.subf %163, %162 : vector<2x128xf32>
    %165 = math.exp %164 : vector<2x128xf32>
    %cst_137 = arith.constant 1.000000e+00 : f32
    %166 = vector.broadcast %cst_137 : f32 to vector<2x128xf32>
    %167 = arith.addf %166, %165 : vector<2x128xf32>
    %168 = tpu.reciprocal %167 {approx = true} : vector<2x128xf32> -> vector<2x128xf32>
    %c0_138 = arith.constant 0 : index
    %c0_139 = arith.constant 0 : index
    %169 = vector.load %arg16[%c0_138, %c0_139] : memref<2x128xf32, #tpu.memory_space<vmem>>, vector<2x128xf32>
    tpu.vector_store %arg16[%c0_138, %c0_139], %168 {strides = array<i32>} : memref<2x128xf32, #tpu.memory_space<vmem>>, vector<2x128xf32>,
    return
  }
}

</mosaic_0001>

<bundles_post_ra>
// kernel: tpu_custom_call.1
= control target key start
LH: loop header
LB: loop body
LE: loop exit
PB: predicated region body
PF: predicated region fallthrough
CT: control target
= control target key end

     0   :  { %s5244_s0 = inlined_call_operand.hbm [shape: bf16[32,64], index: 0, kind: input, shape index: {}]   ;;  %s5245_s1 = inlined_call_operand.hbm [shape: bf16[3,16,32], index: 1, kind: input, shape index: {}]   ;;  %s5246_s2 = inlined_call_operand.hbm [shape: bf16[3,64,256], index: 2, kind: input, shape index: {}]   ;;  %s5247_s3 = inlined_call_operand.hbm [shape: f32[3,256], index: 3, kind: input, shape index: {}]   ;;  %s5248_s4 = inlined_call_operand.hbm [shape: bf16[3,8,16], index: 4, kind: input, shape index: {}]   ;;  %s5249_s5 = inlined_call_operand.hbm [shape: bf16[3,256,256], index: 5, kind: input, shape index: {}]   ;;  %s5250_s6 = inlined_call_operand.vmem [shape: f32[3,256], index: 6, kind: input, shape index: {}]   ;;  %s5251_s7 = inlined_call_operand.hbm [shape: bf16[3,4,8], index: 7, kind: input, shape index: {}]   ;;  %s5252_s8 = inlined_call_operand.hbm [shape: bf16[3,256,256], index: 8, kind: input, shape index: {}]   ;;  %s5253_s9 = inlined_call_operand.vmem [shape: f32[3,256], index: 9, kind: input, shape index: {}]   ;;  %s5254_s10 = inlined_call_operand.hbm [shape: bf16[3,2,4], index: 10, kind: input, shape index: {}]   ;;  %s5255_s11 = inlined_call_operand.hbm [shape: bf16[3,256,256], index: 11, kind: input, shape index: {}]   ;;  %s5256_s12 = inlined_call_operand.hbm [shape: f32[3,256], index: 12, kind: input, shape index: {}]   ;;  %s5257_s13 = inlined_call_operand.vmem [shape: bf16[1,2,2], index: 13, kind: input, shape index: {}]   ;;  %s5258_s14 = inlined_call_operand.hbm [shape: bf16[1,256,128], index: 14, kind: input, shape index: {}]   ;;  %s5259_s15 = inlined_call_operand.vmem [shape: f32[1,128], index: 15, kind: input, shape index: {}]   ;;  %s5260_s16 = inlined_call_operand.hbm [shape: f32[2,128], index: 16, kind: output, shape index: {}]  }
   0x1   :  { %5261 = sst [smem:[#allocation31_spill]] %s5244_s0 }
   0x2   :  { %21 = vsyncpa [#allocation3], 0 }
   0x3   :  { %22 = vsyncpa [#allocation6], 0 }
   0x4   :  { %23 = vsyncpa [#allocation9], 0 }
   0x5   :  { %24 = vsyncpa [#allocation12], 0 }
   0x6   :  { %25 = vsyncpa [#allocation15], 0 }
   0x7   :  { %26 = vsyncpa [#allocation18], 0 }
   0x8   :  { %27 = vsyncpa [#allocation21], 0 }
   0x9   :  { %28 = vsyncpa [#allocation4], 0  ;;  %s4919_s21 = smov [#allocation5]   ;;  %s4920_s23 = smov [#allocation8]  }
   0xa   :  { %s46_s22 = sshll.u32 %s4919_s21, 4  ;;  %s71_s24 = sshll.u32 %s4920_s23, 4  ;;  %s47_s22 = int_to_ptr.vmem [resolvable:$true] %s46_s22  ;;  %s72_s24 = int_to_ptr.vmem [resolvable:$true] %s71_s24 }
   0xb   :  { %s4651_s25 = scalar_lea.vmem %s47_s22, 384  ;;  %p4656_p1 = scmp.lt.s32.totalorder %s47_s22, %s47_s22 }
   0xc   :  { %p4652_p0 = scmp.ne.s32.totalorder %s47_s22, %s4651_s25  ;;  %p4657_p2 = scmp.lt.s32.totalorder %s4651_s25, %s4651_s25 }
   0xe   :  { %p4658_p3 = por %p4657_p2, %p4656_p1 }
  0x10   :  { %p4659_p4 = pnand %p4658_p3, %p4652_p0 }
  0x12   :  { %4662 = shalt.err (!%p4659_p4)
}
  0x13   :  { %s4921_s26 = smov 64   ;;  %s4922_s27 = smov 4  }
  0x14   :  { %52 = dma.hbm_to_vmem [thread:$0]  %s5245_s1, 384, %s47_s22, [#allocation6], %s4921_s26, %s4921_s26, %s4922_s27  }
  0x15   :  { %s4671_s30 = scalar_lea.vmem %s72_s24, 128  ;;  %p4676_p6 = scmp.lt.s32.totalorder %s72_s24, %s72_s24 }
  0x16   :  { %p4672_p5 = scmp.ne.s32.totalorder %s72_s24, %s4671_s30  ;;  %p4677_p7 = scmp.lt.s32.totalorder %s4671_s30, %s4671_s30 }
  0x18   :  { %p4678_p8 = por %p4677_p7, %p4676_p6 }
  0x1a   :  { %p4679_p9 = pnand %p4678_p8, %p4672_p5 }
  0x1c   :  { %4682 = shalt.err (!%p4679_p9)
}
  0x1d   :  { %74 = dma.hbm_to_vmem [thread:$0]  %s5247_s3, 128, %s72_s24, [#allocation9]  }
  0x1e   :  { %s4923_s18 = smov [#allocation11]   ;;  %s4924_s20 = smov [#allocation14]  }
  0x1f   :  { %s92_s19 = sshll.u32 %s4923_s18, 4  ;;  %s118_s21 = sshll.u32 %s4924_s20, 4  ;;  %s93_s19 = int_to_ptr.vmem [resolvable:$true] %s92_s19  ;;  %s119_s21 = int_to_ptr.vmem [resolvable:$true] %s118_s21 }
  0x20   :  { %s4691_s23 = scalar_lea.vmem %s93_s19, 12288  ;;  %p4696_p11 = scmp.lt.s32.totalorder %s93_s19, %s93_s19 }
  0x21   :  { %p4692_p10 = scmp.ne.s32.totalorder %s93_s19, %s4691_s23  ;;  %p4697_p12 = scmp.lt.s32.totalorder %s4691_s23, %s4691_s23 }
  0x23   :  { %p4698_p13 = por %p4697_p12, %p4696_p11 }
  0x25   :  { %p4699_p0 = pnand %p4698_p13, %p4692_p10 }
  0x27   :  { %4702 = shalt.err (!%p4699_p0)
}
  0x28   :  { %s4925_s1 = smov 128   ;;  %s4926_s22 = smov 8  }
  0x29   :  { %98 = dma.hbm_to_vmem [thread:$0]  %s5249_s5, 12288, %s93_s19, [#allocation12], %s4925_s1, %s4925_s1, %s4926_s22  }
  0x2a   :  { %s4711_s24 = scalar_lea.vmem %s119_s21, 12288  ;;  %p4716_p2 = scmp.lt.s32.totalorder %s119_s21, %s119_s21 }
  0x2b   :  { %p4712_p1 = scmp.ne.s32.totalorder %s119_s21, %s4711_s24  ;;  %p4717_p3 = scmp.lt.s32.totalorder %s4711_s24, %s4711_s24 }
  0x2d   :  { %p4718_p4 = por %p4717_p3, %p4716_p2 }
  0x2f   :  { %p4719_p5 = pnand %p4718_p4, %p4712_p1 }
  0x31   :  { %4722 = shalt.err (!%p4719_p5)
}
  0x32   :  { %124 = dma.hbm_to_vmem [thread:$0]  %s5252_s8, 12288, %s119_s21, [#allocation15], %s4925_s1, %s4925_s1, %s4926_s22  }
  0x33   :  { %s4927_s30 = smov [#allocation17]   ;;  %s4928_s17 = smov [#allocation2]  }
  0x34   :  { %s144_s0 = sshll.u32 %s4927_s30, 4  ;;  %s34_s18 = sshll.u32 %s4928_s17, 4  ;;  %s145_s0 = int_to_ptr.vmem [resolvable:$true] %s144_s0  ;;  %s35_s18 = int_to_ptr.vmem [resolvable:$true] %s34_s18 }
  0x35   :  { %s4731_s5 = scalar_lea.vmem %s145_s0, 12288  ;;  %p4736_p7 = scmp.lt.s32.totalorder %s145_s0, %s145_s0 }
  0x36   :  { %p4732_p6 = scmp.ne.s32.totalorder %s145_s0, %s4731_s5  ;;  %p4737_p8 = scmp.lt.s32.totalorder %s4731_s5, %s4731_s5 }
  0x38   :  { %p4738_p9 = por %p4737_p8, %p4736_p7 }
  0x3a   :  { %p4739_p10 = pnand %p4738_p9, %p4732_p6 }
  0x3c   :  { %4742 = shalt.err (!%p4739_p10)
}
  0x3d   :  { %150 = dma.hbm_to_vmem [thread:$0]  %s5255_s11, 12288, %s145_s0, [#allocation18], %s4925_s1, %s4925_s1, %s4926_s22  }
  0x3e   :  { %s4751_s8 = scalar_lea.vmem %s35_s18, 256  ;;  %p4756_p12 = scmp.lt.s32.totalorder %s35_s18, %s35_s18 }
  0x3f   :  { %p4752_p11 = scmp.ne.s32.totalorder %s35_s18, %s4751_s8  ;;  %p4757_p13 = scmp.lt.s32.totalorder %s4751_s8, %s4751_s8 }
  0x41   :  { %p4758_p0 = por %p4757_p13, %p4756_p12 }
  0x43   :  { %p4759_p1 = pnand %p4758_p0, %p4752_p11 }
  0x45   :  { %4762 = shalt.err (!%p4759_p1)
}
  0x46   :  { %s5262_s25 = sld [smem:[#allocation31_spill]]  ;;  %s4929_s3 = smov [#allocation7]  }
  0x47   :  { %s58_s24 = sshll.u32 %s4929_s3, 4  ;;  %s4930_s28 = smov [#allocation10]   ;;  %s59_s24 = int_to_ptr.vmem [resolvable:$true] %s58_s24 }
  0x48   :  { %s80_s29 = sshll.u32 %s4930_s28, 4  ;;  %s4771_s11 = scalar_lea.vmem %s59_s24, 3072  ;;  %s81_s29 = int_to_ptr.vmem [resolvable:$true] %s80_s29 }
  0x49   :  { %p4772_p2 = scmp.ne.s32.totalorder %s59_s24, %s4771_s11  ;;  %p4776_p3 = scmp.lt.s32.totalorder %s59_s24, %s59_s24 }
  0x4a   :  { %p4777_p4 = scmp.lt.s32.totalorder %s4771_s11, %s4771_s11 }
  0x4c   :  { %40 = dma.hbm_to_vmem [thread:$0]  %s5262_s25, 256, %s35_s18, [#allocation3], %s4921_s26, %s4921_s26, %s4922_s27  }
  0x4d   :  { %p4778_p5 = por %p4777_p4, %p4776_p3 }
  0x4f   :  { %p4779_p6 = pnand %p4778_p5, %p4772_p2 }
  0x51   :  { %4782 = shalt.err (!%p4779_p6)
}
  0x52   :  { %64 = dma.hbm_to_vmem [thread:$0]  %s5246_s2, 3072, %s59_s24, [#allocation6], %s4925_s1, %s4925_s1, %s4926_s22  }
  0x53   :  { %s4791_s17 = scalar_lea.vmem %s81_s29, 192  ;;  %p4796_p8 = scmp.lt.s32.totalorder %s81_s29, %s81_s29 }
  0x54   :  { %p4792_p7 = scmp.ne.s32.totalorder %s81_s29, %s4791_s17  ;;  %p4797_p9 = scmp.lt.s32.totalorder %s4791_s17, %s4791_s17 }
  0x56   :  { %p4798_p10 = por %p4797_p9, %p4796_p8 }
  0x58   :  { %p4799_p11 = pnand %p4798_p10, %p4792_p7 }
  0x5a   :  { %4802 = shalt.err (!%p4799_p11)
}
  0x5b   :  { %86 = dma.hbm_to_vmem [thread:$0]  %s5248_s4, 192, %s81_s29, [#allocation9], %s4921_s26, %s4921_s26, %s4922_s27  }
  0x5c   :  { %s4931_s19 = smov [#allocation13]  }
  0x5d   :  { %s106_s20 = sshll.u32 %s4931_s19, 4  ;;  %s107_s20 = int_to_ptr.vmem [resolvable:$true] %s106_s20 }
  0x5e   :  { %s4811_s8 = scalar_lea.vmem %s107_s20, 96  ;;  %p4816_p13 = scmp.lt.s32.totalorder %s107_s20, %s107_s20 }
  0x5f   :  { %p4812_p12 = scmp.ne.s32.totalorder %s107_s20, %s4811_s8  ;;  %p4817_p0 = scmp.lt.s32.totalorder %s4811_s8, %s4811_s8 }
  0x61   :  { %p4818_p1 = por %p4817_p0, %p4816_p13 }
  0x63   :  { %p4819_p2 = pnand %p4818_p1, %p4812_p12 }
  0x65   :  { %4822 = shalt.err (!%p4819_p2)
}
  0x66   :  { %s4932_s2 = smov 32   ;;  %s4933_s1 = smov 2  }
  0x67   :  { %112 = dma.hbm_to_vmem [thread:$0]  %s5251_s7, 96, %s107_s20, [#allocation12], %s4932_s2, %s4932_s2, %s4933_s1  }
  0x68   :  { %s4934_s23 = smov [#allocation16]  }
  0x69   :  { %s132_s25 = sshll.u32 %s4934_s23, 4  ;;  %s133_s25 = int_to_ptr.vmem [resolvable:$true] %s132_s25 }
  0x6a   :  { %s4831_s4 = scalar_lea.vmem %s133_s25, 48  ;;  %s4835_s3 = scalar_lea.vmem %s133_s25, 64 }
  0x6b   :  { %p4832_p3 = scmp.ne.s32.totalorder %s133_s25, %s4831_s4  ;;  %p4836_p4 = scmp.lt.s32.totalorder %s133_s25, %s133_s25 }
  0x6c   :  { %p4837_p5 = scmp.lt.s32.totalorder %s4835_s3, %s4831_s4 }
  0x6e   :  { %p4838_p6 = por %p4837_p5, %p4836_p4 }
  0x70   :  { %p4839_p7 = pnand %p4838_p6, %p4832_p3 }
  0x72   :  { %4842 = shalt.err (!%p4839_p7)
}
  0x73   :  { %s4935_s24 = smov 16   ;;  %s4936_s28 = smov 1  }
  0x74   :  { %138 = dma.hbm_to_vmem [thread:$0]  %s5254_s10, 48, %s133_s25, [#allocation15], %s4935_s24, %s4935_s24, %s4936_s28  }
  0x75   :  { %s4937_s30 = smov [#allocation19]   ;;  %s4938_s7 = smov [#allocation20]  }
  0x76   :  { %s157_s0 = sshll.u32 %s4937_s30, 4  ;;  %s168_s17 = sshll.u32 %s4938_s7, 4  ;;  %s158_s0 = int_to_ptr.vmem [resolvable:$true] %s157_s0  ;;  %s169_s17 = int_to_ptr.vmem [resolvable:$true] %s168_s17 }
  0x77   :  { %s4851_s18 = scalar_lea.vmem %s158_s0, 128  ;;  %p4856_p9 = scmp.lt.s32.totalorder %s158_s0, %s158_s0 }
  0x78   :  { %p4852_p8 = scmp.ne.s32.totalorder %s158_s0, %s4851_s18  ;;  %p4857_p10 = scmp.lt.s32.totalorder %s4851_s18, %s4851_s18 }
  0x7a   :  { %p4858_p11 = por %p4857_p10, %p4856_p9 }
  0x7c   :  { %p4859_p12 = pnand %p4858_p11, %p4852_p8 }
  0x7e   :  { %4862 = shalt.err (!%p4859_p12)
}
  0x7f   :  { %160 = dma.hbm_to_vmem [thread:$0]  %s5256_s12, 128, %s158_s0, [#allocation18]  }
  0x80   :  { %s4871_s20 = scalar_lea.vmem %s169_s17, 2048  ;;  %p4876_p0 = scmp.lt.s32.totalorder %s169_s17, %s169_s17 }
  0x81   :  { %p4872_p13 = scmp.ne.s32.totalorder %s169_s17, %s4871_s20  ;;  %p4877_p1 = scmp.lt.s32.totalorder %s4871_s20, %s4871_s20 }
  0x83   :  { %p4878_p2 = por %p4877_p1, %p4876_p0 }
  0x85   :  { %p4879_p3 = pnand %p4878_p2, %p4872_p13 }
  0x87   :  { %4882 = shalt.err (!%p4879_p3)
}
  0x88   :  { %174 = dma.hbm_to_vmem [thread:$0]  %s5258_s14, 2048, %s169_s17, [#allocation21], %s4921_s26, %s4921_s26, %s4922_s27  }
  0x89   :  { %4903 = dma.done.wait [#allocation3], 256  }
  0x8a   :  { %4904 = vsyncadd [#allocation3], 4294967040 }
  0x8b   :  { %4905 = dma.done.wait [#allocation6], 3456  }
  0x8c   :  { %4906 = vsyncadd [#allocation6], 4294963840 }
  0x8d   :  { %4907 = dma.done.wait [#allocation9], 320  }
  0x8e   :  { %4908 = vsyncadd [#allocation9], 4294966976 }
  0x8f   :  { %4909 = dma.done.wait [#allocation12], 12384  }
  0x90   :  { %4910 = vsyncadd [#allocation12], 4294954912 }
  0x91   :  { %4911 = dma.done.wait [#allocation15], 12336  }
  0x92   :  { %4912 = vsyncadd [#allocation15], 4294954960 }
  0x93   :  { %4913 = dma.done.wait [#allocation18], 12416  }
  0x94   :  { %4914 = vsyncadd [#allocation18], 4294954880 }
  0x95   :  { %4915 = dma.done.wait [#allocation21], 2048  }
  0x96   :  { %4916 = vsyncadd [#allocation21], 4294965248  ;;  %v4939_v0 = vmov 0.0   ;;  %vm4940_vm0 = vmmov 0   ;;  %v5091_v1 = vld [vmem:[#allocation2 + $0x8] sm:$0xff]   ;;  %v5094_v2 = vld [vmem:[#allocation2] sm:$0xff]  }
  0x97   :  { %4102 = vmatprep.subr.bf16.mxu1 %v4939_v0  ;;  %4106 = vmatprep.mubr.msk.bf16.mxu1 %vm4940_vm0, %v4939_v0  ;;  %v4152_v3 = vld [vmem:[#allocation5] sm:$0xff]   ;;  %vm237_vm1 = vcmask 261120   ;;  %v4160_v4 = vld [vmem:[#allocation7 + $0x74] ss:$8 sps:$4 sm:$0xff]   ;;  %v4154_v7 = vld [vmem:[#allocation7 + $0x30] ss:$8 sps:$4 sm:$0xff]  }
  0x98   :  { %4103 = vmatpush3.bf16.msra.mxu1 %v5091_v1  ;;  %v4156_v5 = vld [vmem:[#allocation7 + $0x34] ss:$8 sps:$4 sm:$0xff]   ;;  %405 = vmatprep.subr.bf16.mxu0 %v4160_v4  ;;  %v4159_v8 = vld [vmem:[#allocation7 + $0x24] ss:$8 sps:$4 sm:$0xff]   ;;  %v4157_v9 = vld [vmem:[#allocation7 + $0x20] ss:$8 sps:$4 sm:$0xff]  }
  0x99   :  { %4104 = vmatprep.subr.bf16.mxu1 %v4939_v0  ;;  %v4153_v6 = vld [vmem:[#allocation5 + $0x8] sm:$0xff]   ;;  %v4166_v13 = vld [vmem:[#allocation7 + $0x64] ss:$8 sps:$4 sm:$0xff]   ;;  %v4168_v15 = vld [vmem:[#allocation7] ss:$8 sps:$4 sm:$0xff]   ;;  %v4941_v18 = vmov 0  }
  0x9a   :  { %v4164_v10 = vld [vmem:[#allocation7 + $0x14] ss:$8 sps:$4 sm:$0xff]   ;;  %v4162_v11 = vld [vmem:[#allocation7 + $0x10] ss:$8 sps:$4 sm:$0xff]   ;;  %v4170_v14 = vld [vmem:[#allocation7 + $0x4] ss:$8 sps:$4 sm:$0xff]   ;;  %429 = vmatprep.mubr.bf16.mxu0 %v4941_v18 }
  0x9b   :  { %v4165_v12 = vld [vmem:[#allocation7 + $0x70] ss:$8 sps:$4 sm:$0xff]   ;;  %v4171_v16 = vld [vmem:[#allocation7 + $0x60] ss:$8 sps:$4 sm:$0xff]   ;;  %v4172_v17 = vld [vmem:[#allocation7 + $0x54] ss:$8 sps:$4 sm:$0xff]  }
  0x9c   :  { %4105 = vmatpush3.bf16.msra.mxu1 %v5094_v2  ;;  %406 = vmatpush1.bf16.msra.mxu0 %v4165_v12  ;;  %v4174_v19 = vld [vmem:[#allocation7 + $0x50] ss:$8 sps:$4 sm:$0xff]   ;;  %v4175_v20 = vld [vmem:[#allocation7 + $0x44] ss:$8 sps:$4 sm:$0xff]   ;;  %v4177_v21 = vld [vmem:[#allocation7 + $0x40] ss:$8 sps:$4 sm:$0xff]  }
  0x9d   :  { %4110 = vmatprep.subr.bf16.mxu1 %v4939_v0  ;;  %407 = vmatprep.subr.bf16.mxu0 %v4166_v13  ;;  %vm393_vm2 = vcmask 523264   ;;  %v4178_v32 = vld [vmem:[#allocation5 + $0x10] sm:$0xff]   ;;  %v4184_v35 = vld [vmem:[#allocation7 + $0xa4] ss:$8 sps:$4 sm:$0xff]   ;;  %v4182_v36 = vld [vmem:[#allocation7 + $0xa0] ss:$8 sps:$4 sm:$0xff]  }
  0x9e   :  { %v4181_v33 = vld [vmem:[#allocation7 + $0xb4] ss:$8 sps:$4 sm:$0xff]   ;;  %v4179_v34 = vld [vmem:[#allocation7 + $0xb0] ss:$8 sps:$4 sm:$0xff]   ;;  %v4190_v39 = vld [vmem:[#allocation7 + $0x84] ss:$8 sps:$4 sm:$0xff]  }
  0x9f   :  { %4107 = vmatmul.mubr.msk.bf16.vlgmr.msra.gmra.mxu1 %vm237_vm1, %v4152_v3  ;;  %v4187_v37 = vld [vmem:[#allocation7 + $0x94] ss:$8 sps:$4 sm:$0xff]   ;;  %v4185_v38 = vld [vmem:[#allocation7 + $0x90] ss:$8 sps:$4 sm:$0xff]   ;;  %v4188_v40 = vld [vmem:[#allocation7 + $0x80] ss:$8 sps:$4 sm:$0xff]  }
  0xa0   :  { %4111 = vmatpush3.bf16.msra.mxu1 %v5091_v1  ;;  %4114 = vmatprep.mubr.msk.bf16.mxu1 %vm4940_vm0, %v4939_v0  ;;  %v4193_v41 = vld [vmem:[#allocation11 + $0x174] ss:$8 sps:$4 sm:$0xff]   ;;  %v4191_v49 = vld [vmem:[#allocation11 + $0x170] ss:$8 sps:$4 sm:$0xff]   ;;  %v4196_v51 = vld [vmem:[#allocation11 + $0x164] ss:$8 sps:$4 sm:$0xff]  }
  0xa1   :  { %4112 = vmatprep.subr.bf16.mxu1 %v4939_v0  ;;  %408 = vmatpush1.bf16.msra.mxu0 %v4171_v16  ;;  %v4194_v53 = vld [vmem:[#allocation11 + $0x160] ss:$8 sps:$4 sm:$0xff]   ;;  %v4199_v54 = vld [vmem:[#allocation11 + $0x154] ss:$8 sps:$4 sm:$0xff]   ;;  %v4197_v55 = vld [vmem:[#allocation11 + $0x150] ss:$8 sps:$4 sm:$0xff]  }
  0xa2   :  { %409 = vmatprep.subr.bf16.mxu0 %v4172_v17  ;;  %v4202_v56 = vld [vmem:[#allocation11 + $0x144] ss:$8 sps:$4 sm:$0xff]   ;;  %v4200_v57 = vld [vmem:[#allocation11 + $0x140] ss:$8 sps:$4 sm:$0xff]   ;;  %v4205_v58 = vld [vmem:[#allocation11 + $0x134] ss:$8 sps:$4 sm:$0xff]  }
  0xa3   :  { %v4203_v59 = vld [vmem:[#allocation11 + $0x130] ss:$8 sps:$4 sm:$0xff]   ;;  %v4208_v60 = vld [vmem:[#allocation11 + $0x124] ss:$8 sps:$4 sm:$0xff]   ;;  %v4206_v61 = vld [vmem:[#allocation11 + $0x120] ss:$8 sps:$4 sm:$0xff]  }
  0xa4   :  { %4113 = vmatpush3.bf16.msra.mxu1 %v5094_v2  ;;  %v4211_v62 = vld [vmem:[#allocation11 + $0x114] ss:$8 sps:$4 sm:$0xff]   ;;  %v4209_v63 = vld [vmem:[#allocation11 + $0x110] ss:$8 sps:$4 sm:$0xff]   ;;  %v4220_v4 = vld [vmem:[#allocation11 + $0x1e4] ss:$8 sps:$4 sm:$0xff]  }
  0xa5   :  { %491 = vmatprep.subr.bf16.mxu1 %v4156_v5  ;;  %410 = vmatpush1.bf16.msra.mxu0 %v4174_v19  ;;  %v4215_v3 = vld [vmem:[#allocation11 + $0x1f0] ss:$8 sps:$4 sm:$0xff]   ;;  %v4218_v5 = vld [vmem:[#allocation11 + $0x1e0] ss:$8 sps:$4 sm:$0xff]   ;;  %v4232_v12 = vld [vmem:[#allocation11 + $0x1a4] ss:$8 sps:$4 sm:$0xff]  }
  0xa6   :  { %411 = vmatprep.subr.bf16.mxu0 %v4175_v20  ;;  %v4230_v13 = vld [vmem:[#allocation11 + $0x1a0] ss:$8 sps:$4 sm:$0xff]   ;;  %v4238_v16 = vld [vmem:[#allocation11 + $0x184] ss:$8 sps:$4 sm:$0xff]   ;;  %v680_v20 = vlaneseq  ;;  %vm743_vm7 = vcmask 130048   ;;  %vm1646_vm10 = vcmask 1043456  }
  0xa7   :  { %4115 = vmatmul.mubr.msk.bf16.vlgmr.msra.gmra.mxu1 %vm237_vm1, %v4153_v6  ;;  %v4223_v6 = vld [vmem:[#allocation11 + $0x1d4] ss:$8 sps:$4 sm:$0xff]   ;;  %v4236_v17 = vld [vmem:[#allocation11 + $0x180] ss:$8 sps:$4 sm:$0xff]   ;;  %vm1642_vm11 = vcmask 64512   ;;  %vm2552_vm14 = vcmask 1041408  }
  0xa8   :  { %492 = vmatpush1.bf16.msra.mxu1 %v4154_v7  ;;  %515 = vmatprep.mubr.bf16.mxu1 %v4941_v18  ;;  %v4221_v7 = vld [vmem:[#allocation11 + $0x1d0] ss:$8 sps:$4 sm:$0xff]   ;;  %vm2548_vm15 = vcmask 31744   ;;  %s4942_s28 = smov [#allocation22]  }
  0xa9   :  { %493 = vmatprep.subr.bf16.mxu1 %v4159_v8  ;;  %412 = vmatpush1.bf16.msra.mxu0 %v4177_v21  ;;  %v4226_v8 = vld [vmem:[#allocation11 + $0x1c4] ss:$8 sps:$4 sm:$0xff]   ;;  %s3695_s29 = sshll.u32 %s4942_s28, 4  ;;  %s3696_s29 = int_to_ptr.vmem [resolvable:$true] %s3695_s29 }
  0xaa   :  { %4118 = vmatprep.subr.bf16.mxu0 %v4939_v0  ;;  %s4883_s11 = scalar_lea.vmem %s3696_s29, 32  ;;  %p4888_p5 = scmp.lt.s32.totalorder %s3696_s29, %s3696_s29 }
  0xab   :  { %p4884_p4 = scmp.ne.s32.totalorder %s3696_s29, %s4883_s11  ;;  %p4889_p6 = scmp.lt.s32.totalorder %s4883_s11, %s4883_s11 }
  0xac   :  { %494 = vmatpush1.bf16.msra.mxu1 %v4157_v9  ;;  %v4224_v9 = vld [vmem:[#allocation11 + $0x1c0] ss:$8 sps:$4 sm:$0xff]  }
  0xad   :  { %495 = vmatprep.subr.bf16.mxu1 %v4164_v10  ;;  %v4229_v10 = vld [vmem:[#allocation11 + $0x1b4] ss:$8 sps:$4 sm:$0xff]   ;;  %p4890_p7 = por %p4889_p6, %p4888_p5 }
  0xaf   :  { %p4891_p8 = pnand %p4890_p7, %p4884_p4 }
  0xb0   :  { %496 = vmatpush1.bf16.msra.mxu1 %v4162_v11  ;;  %v4227_v11 = vld [vmem:[#allocation11 + $0x1b0] ss:$8 sps:$4 sm:$0xff]  }
  0xb1   :  { %497 = vmatprep.subr.bf16.mxu1 %v4170_v14  ;;  %v4235_v14 = vld [vmem:[#allocation11 + $0x194] ss:$8 sps:$4 sm:$0xff]  }
  0xb4   :  { %498 = vmatpush1.bf16.msra.mxu1 %v4168_v15  ;;  %v4233_v15 = vld [vmem:[#allocation11 + $0x190] ss:$8 sps:$4 sm:$0xff]  }
  0xb5   :  { %639 = vmatprep.subr.bf16.mxu1 %v4181_v33 }
 0x15f   :  { %v275_v22 = vpop.f32.mrf.mxu1 }
 0x161   :  { %v4108_v23 = vpop.f32.mrf.mxu1 }
 0x163   :  { %v278_v24 = vpop.f32.mrf.mxu1 }
 0x164   :  { %v282_v25 = vpack.c.bf16 %v278_v24, %v275_v22  ;;  %v681_v22 = vshrl.u32 %v680_v20, 7  ;;  %v4254_v20 = vld [vmem:[#allocation11 + $0x20] ss:$8 sps:$4 sm:$0xff]  }
 0x165   :  { %v4109_v26 = vpop.f32.mrf.mxu1 }
 0x166   :  { %3733 = vmatmul.mubr.msk.bf16.vlgmr.msra.gmra.mxu1 %vm393_vm2, %v282_v25  ;;  %v5128_v24 = vsub.s32 0, %v681_v22  ;;  %v678_v25 = vld [vmem:[#allocation8] ss:$4 sm:$0x3]  ;;  %v5130_v26 = vsub.s32 1, %v681_v22 }
 0x167   :  { %v336_v27 = vpop.f32.mrf.mxu1  ;;  %663 = vmatprep.mubr.bf16.mxu1 %v4941_v18  ;;  %640 = vmatpush1.bf16.msra.mxu1 %v4179_v34  ;;  %v4257_v22 = vld [vmem:[#allocation11 + $0x10] ss:$8 sps:$4 sm:$0xff]  }
 0x168   :  { %641 = vmatprep.subr.bf16.mxu1 %v4184_v35  ;;  %v687_v33 = vrot.slane %v678_v25, %v5130_v26 }
 0x169   :  { %v4116_v28 = vpop.f32.mrf.mxu1 }
 0x16b   :  { %v339_v29 = vpop.f32.mrf.mxu1  ;;  %642 = vmatpush1.bf16.msra.mxu1 %v4182_v36 }
 0x16c   :  { %v343_v30 = vpack.c.bf16 %v339_v29, %v336_v27  ;;  %643 = vmatprep.subr.bf16.mxu1 %v4187_v37  ;;  %v683_v29 = vrot.slane %v678_v25, %v5128_v24  ;;  %v707_v37 = vld [vmem:[#allocation8 + $0x1] ss:$4 sm:$0x3]  ;;  %v4260_v25 = vld [vmem:[#allocation11] ss:$8 sps:$4 sm:$0xff]  }
 0x16d   :  { %v4117_v31 = vpop.f32.mrf.mxu1 }
 0x16e   :  { %3724 = vmatmul.mubr.msk.bf16.vlgmr.msra.gmra.mxu0 %vm393_vm2, %v343_v30 }
 0x16f   :  { %4119 = vmatpush3.bf16.msra.mxu0 %v5091_v1  ;;  %4122 = vmatprep.mubr.msk.bf16.mxu0 %vm4940_vm0, %v4939_v0  ;;  %v4212_v1 = vld [vmem:[#allocation11 + $0x100] ss:$8 sps:$4 sm:$0xff]  }
 0x170   :  { %4120 = vmatprep.subr.bf16.mxu0 %v4939_v0  ;;  %644 = vmatpush1.bf16.msra.mxu1 %v4185_v38  ;;  %v4214_v0 = vld [vmem:[#allocation11 + $0x104] ss:$8 sps:$4 sm:$0xff]  }
 0x171   :  { %645 = vmatprep.subr.bf16.mxu1 %v4190_v39 }
 0x173   :  { %4121 = vmatpush3.bf16.msra.mxu0 %v5094_v2  ;;  %v4217_v2 = vld [vmem:[#allocation11 + $0x1f4] ss:$8 sps:$4 sm:$0xff]  }
 0x174   :  { %646 = vmatpush1.bf16.msra.mxu1 %v4188_v40 }
 0x175   :  { %1063 = vmatprep.subr.bf16.mxu1 %v4193_v41 }
 0x176   :  { %4123 = vmatmul.mubr.msk.bf16.vlgmr.msra.gmra.mxu0 %vm237_vm1, %v4178_v32 }
 0x177   :  { %779 = vmatprep.mubr.bf16.mxu0 %v4941_v18 }
 0x226   :  { %v517_v19 = vpop.f32.mrf.mxu1 }
 0x228   :  { %v519_v21 = vpop.f32.mrf.mxu1 }
 0x22a   :  { %v521_v23 = vpop.f32.mrf.mxu1 }
 0x22c   :  { %v523_v27 = vpop.f32.mrf.mxu1 }
 0x22e   :  { %v5119_v42 = vpop.f32.mrf.mxu0 }
 0x22f   :  { %v518_v28 = vadd.f32 %v517_v19, %v5119_v42  ;;  %v4256_v19 = vld [vmem:[#allocation11 + $0x24] ss:$8 sps:$4 sm:$0xff]  }
 0x230   :  { %v5121_v43 = vpop.f32.mrf.mxu0 }
 0x231   :  { %v520_v31 = vadd.f32 %v519_v21, %v5121_v43  ;;  %v4259_v21 = vld [vmem:[#allocation11 + $0x14] ss:$8 sps:$4 sm:$0xff]  }
 0x232   :  { %v5123_v44 = vpop.f32.mrf.mxu0 }
 0x233   :  { %v522_v35 = vadd.f32 %v521_v23, %v5123_v44  ;;  %v4262_v23 = vld [vmem:[#allocation11 + $0x4] ss:$8 sps:$4 sm:$0xff]  }
 0x234   :  { %v5125_v45 = vpop.f32.mrf.mxu0 }
 0x235   :  { %v524_v42 = vadd.f32 %v523_v27, %v5125_v45  ;;  %v4265_v27 = vld [vmem:[#allocation11 + $0xf4] ss:$8 sps:$4 sm:$0xff]  }
 0x236   :  { %v571_v46 = vpop.f32.mrf.mxu0 }
 0x238   :  { %v4124_v47 = vpop.f32.mrf.mxu0 }
 0x239   :  { %v712_v47 = vrot.slane %v707_v37, %v5128_v24 }
 0x23a   :  { %v574_v48 = vpop.f32.mrf.mxu0 }
 0x23b   :  { %v578_v50 = vpack.c.bf16 %v574_v48, %v571_v46 }
 0x23c   :  { %v4125_v52 = vpop.f32.mrf.mxu0 }
 0x23d   :  { %3744 = vmatmul.mubr.msk.bf16.vlgmr.msra.gmra.mxu1 %vm393_vm2, %v578_v50  ;;  %vm3458_vm2 = vcmask 1040384  }
 0x23e   :  { %1064 = vmatpush1.bf16.msra.mxu1 %v4191_v49 }
 0x23f   :  { %1065 = vmatprep.subr.bf16.mxu1 %v4196_v51  ;;  %v724_v51 = vld [vmem:[#allocation8 + $0x2] ss:$4 sm:$0x3] }
 0x242   :  { %1066 = vmatpush1.bf16.msra.mxu1 %v4194_v53  ;;  %v716_v53 = vrot.slane %v707_v37, %v5130_v26  ;;  %v4280_v37 = vld [vmem:[#allocation11 + $0xa4] ss:$8 sps:$4 sm:$0xff]  }
 0x243   :  { %1067 = vmatprep.subr.bf16.mxu1 %v4199_v54 }
 0x246   :  { %1068 = vmatpush1.bf16.msra.mxu1 %v4197_v55 }
 0x247   :  { %1069 = vmatprep.subr.bf16.mxu1 %v4202_v56 }
 0x24a   :  { %1070 = vmatpush1.bf16.msra.mxu1 %v4200_v57  ;;  %v729_v57 = vrot.slane %v724_v51, %v5128_v24 }
 0x24b   :  { %1071 = vmatprep.subr.bf16.mxu1 %v4205_v58 }
 0x24e   :  { %1072 = vmatpush1.bf16.msra.mxu1 %v4203_v59 }
 0x24f   :  { %1073 = vmatprep.subr.bf16.mxu1 %v4208_v60 }
 0x252   :  { %1074 = vmatpush1.bf16.msra.mxu1 %v4206_v61  ;;  %v733_v61 = vrot.slane %v724_v51, %v5130_v26 }
 0x253   :  { %1075 = vmatprep.subr.bf16.mxu1 %v4211_v62 }
 0x256   :  { %1076 = vmatpush1.bf16.msra.mxu1 %v4209_v63 }
 0x257   :  { %1077 = vmatprep.subr.bf16.mxu1 %v4214_v0 }
 0x25a   :  { %1078 = vmatpush1.bf16.msra.mxu1 %v4212_v1 }
 0x25b   :  { %1079 = vmatprep.subr.bf16.mxu1 %v4217_v2 }
 0x25e   :  { %1080 = vmatpush2.bf16.msra.mxu1 %v4215_v3 }
 0x25f   :  { %1081 = vmatprep.subr.bf16.mxu1 %v4220_v4 }
 0x262   :  { %1082 = vmatpush2.bf16.msra.mxu1 %v4218_v5 }
 0x263   :  { %1083 = vmatprep.subr.bf16.mxu1 %v4223_v6  ;;  %v742_v6 = vld [vmem:[#allocation10] sm:$0xf] }
 0x266   :  { %1084 = vmatpush2.bf16.msra.mxu1 %v4221_v7  ;;  %v4241_v7 = vld [vmem:[#allocation11 + $0x74] ss:$8 sps:$4 sm:$0xff]  }
 0x267   :  { %1085 = vmatprep.subr.bf16.mxu1 %v4226_v8  ;;  %v823_v8 = vld [vmem:[#allocation10 + $0x4] sm:$0xf] }
 0x26a   :  { %1086 = vmatpush2.bf16.msra.mxu1 %v4224_v9  ;;  %v4239_v9 = vld [vmem:[#allocation11 + $0x70] ss:$8 sps:$4 sm:$0xff]  }
 0x26b   :  { %1087 = vmatprep.subr.bf16.mxu1 %v4229_v10  ;;  %v4244_v10 = vld [vmem:[#allocation11 + $0x64] ss:$8 sps:$4 sm:$0xff]  }
 0x26e   :  { %1088 = vmatpush2.bf16.msra.mxu1 %v4227_v11  ;;  %v4242_v11 = vld [vmem:[#allocation11 + $0x60] ss:$8 sps:$4 sm:$0xff]  }
 0x26f   :  { %1089 = vmatprep.subr.bf16.mxu1 %v4232_v12  ;;  %v4247_v12 = vld [vmem:[#allocation11 + $0x54] ss:$8 sps:$4 sm:$0xff]  }
 0x272   :  { %1090 = vmatpush2.bf16.msra.mxu1 %v4230_v13  ;;  %v4245_v13 = vld [vmem:[#allocation11 + $0x50] ss:$8 sps:$4 sm:$0xff]  }
 0x273   :  { %1091 = vmatprep.subr.bf16.mxu1 %v4235_v14  ;;  %v4250_v14 = vld [vmem:[#allocation11 + $0x44] ss:$8 sps:$4 sm:$0xff]  }
 0x276   :  { %1092 = vmatpush2.bf16.msra.mxu1 %v4233_v15  ;;  %v4248_v15 = vld [vmem:[#allocation11 + $0x40] ss:$8 sps:$4 sm:$0xff]  }
 0x277   :  { %1093 = vmatprep.subr.bf16.mxu1 %v4238_v16  ;;  %v4253_v16 = vld [vmem:[#allocation11 + $0x34] ss:$8 sps:$4 sm:$0xff]  }
 0x27a   :  { %1094 = vmatpush2.bf16.msra.mxu1 %v4236_v17  ;;  %v4251_v17 = vld [vmem:[#allocation11 + $0x30] ss:$8 sps:$4 sm:$0xff]  }
 0x2fd   :  { %v665_v30 = vpop.f32.mrf.mxu1 }
 0x2fe   :  { %v674_v32 = vadd.f32 %v665_v30, %v518_v28  ;;  %v4263_v28 = vld [vmem:[#allocation11 + $0xf0] ss:$8 sps:$4 sm:$0xff]   ;;  %v4266_v30 = vld [vmem:[#allocation11 + $0xe0] ss:$8 sps:$4 sm:$0xff]  }
 0x2ff   :  { %v667_v34 = vpop.f32.mrf.mxu1 }
 0x300   :  { %v690_v36 = vadd.f32 %v683_v29, %v674_v32  ;;  %v675_v38 = vadd.f32 %v667_v34, %v520_v31  ;;  %v4271_v31 = vld [vmem:[#allocation11 + $0xd4] ss:$8 sps:$4 sm:$0xff]   ;;  %v4269_v32 = vld [vmem:[#allocation11 + $0xd0] ss:$8 sps:$4 sm:$0xff]   ;;  %v4272_v34 = vld [vmem:[#allocation11 + $0xc0] ss:$8 sps:$4 sm:$0xff]  }
 0x301   :  { %v669_v39 = vpop.f32.mrf.mxu1 }
 0x302   :  { %vm694_vm3 = vcmp.ge.f32.partialorder %v690_v36, 0.0  ;;  %v698_v40 = vmul.f32 0.2, %v690_v36  ;;  %v691_v41 = vadd.f32 %v687_v33, %v675_v38  ;;  %v676_v46 = vadd.f32 %v669_v39, %v522_v35  ;;  %v4277_v35 = vld [vmem:[#allocation11 + $0xb4] ss:$8 sps:$4 sm:$0xff]  }
 0x303   :  { %v671_v48 = vpop.f32.mrf.mxu1  ;;  %v4278_v38 = vld [vmem:[#allocation11 + $0xa0] ss:$8 sps:$4 sm:$0xff]   ;;  %v4283_v39 = vld [vmem:[#allocation11 + $0x94] ss:$8 sps:$4 sm:$0xff]  }
 0x304   :  { %v702_v43 = vsel %vm694_vm3, %v690_v36, %v698_v40  ;;  %vm695_vm4 = vcmp.ge.f32.partialorder %v691_v41, 0.0  ;;  %v699_v49 = vmul.f32 0.2, %v691_v41  ;;  %v692_v50 = vadd.f32 %v683_v29, %v676_v46  ;;  %v4268_v29 = vld [vmem:[#allocation11 + $0xe4] ss:$8 sps:$4 sm:$0xff]  }
 0x305   :  { %v677_v52 = vadd.f32 %v671_v48, %v524_v42  ;;  %v719_v54 = vmul.f32 %v712_v47, %v702_v43  ;;  %v4275_v36 = vld [vmem:[#allocation11 + $0xb0] ss:$8 sps:$4 sm:$0xff]   ;;  %v4284_v46 = vld [vmem:[#allocation11 + $0x80] ss:$8 sps:$4 sm:$0xff]   ;;  %v4289_v42 = vld [vmem:[#allocation11 + $0x274] ss:$8 sps:$4 sm:$0xff]  }
 0x306   :  { %vm696_vm5 = vcmp.ge.f32.partialorder %v692_v50, 0.0  ;;  %v700_v44 = vmul.f32 0.2, %v692_v50  ;;  %v703_v55 = vsel %vm695_vm4, %v691_v41, %v699_v49  ;;  %v4281_v40 = vld [vmem:[#allocation11 + $0x90] ss:$8 sps:$4 sm:$0xff]   ;;  %vm3454_vm3 = vcmask 15360  }
 0x307   :  { %v693_v56 = vadd.f32 %v687_v33, %v677_v52  ;;  %v720_v60 = vmul.f32 %v716_v53, %v703_v55  ;;  %v736_v63 = vadd.f32 %v729_v57, %v719_v54  ;;  %v4274_v33 = vld [vmem:[#allocation11 + $0xc4] ss:$8 sps:$4 sm:$0xff]   ;;  %v4287_v49 = vld [vmem:[#allocation11 + $0x270] ss:$8 sps:$4 sm:$0xff]   ;;  %v4295_v55 = vld [vmem:[#allocation11 + $0x254] ss:$8 sps:$4 sm:$0xff]  }
 0x308   :  { %v704_v58 = vsel %vm696_vm5, %v692_v50, %v700_v44  ;;  %v4286_v41 = vld [vmem:[#allocation11 + $0x84] ss:$8 sps:$4 sm:$0xff]  }
 0x309   :  { %v721_v45 = vmul.f32 %v712_v47, %v704_v58  ;;  %vm697_vm6 = vcmp.ge.f32.partialorder %v693_v56, 0.0  ;;  %v701_v59 = vmul.f32 0.2, %v693_v56  ;;  %v737_v3 = vadd.f32 %v733_v61, %v720_v60  ;;  %v4292_v52 = vld [vmem:[#allocation11 + $0x264] ss:$8 sps:$4 sm:$0xff]  }
 0x30a   :  { %v4298_v60 = vld [vmem:[#allocation11 + $0x244] ss:$8 sps:$4 sm:$0xff]  }
 0x30b   :  { %v705_v62 = vsel %vm697_vm6, %v693_v56, %v701_v59  ;;  %v738_v0 = vadd.f32 %v729_v57, %v721_v45  ;;  %v4293_v59 = vld [vmem:[#allocation11 + $0x250] ss:$8 sps:$4 sm:$0xff]  }
 0x30c   :  { %v722_v1 = vmul.f32 %v716_v53, %v705_v62  ;;  %v4290_v53 = vld [vmem:[#allocation11 + $0x260] ss:$8 sps:$4 sm:$0xff]  }
 0x30d   :  { %v5142_v2 = vpack.c.bf16 %v738_v0, %v736_v63  ;;  %v4296_v62 = vld [vmem:[#allocation11 + $0x240] ss:$8 sps:$4 sm:$0xff]   ;;  %v4301_v63 = vld [vmem:[#allocation11 + $0x234] ss:$8 sps:$4 sm:$0xff]  }
 0x30e   :  { %v739_v4 = vadd.f32 %v733_v61, %v722_v1  ;;  %v1306_v0 = vld [vmem:[#allocation10 + $0x8] sm:$0xf]  ;;  %v4299_v1 = vld [vmem:[#allocation11 + $0x230] ss:$8 sps:$4 sm:$0xff]  }
 0x310   :  { %v741_v5 = vpack.c.bf16 %v739_v4, %v737_v3  ;;  %v4304_v3 = vld [vmem:[#allocation11 + $0x224] ss:$8 sps:$4 sm:$0xff]   ;;  %v4302_v4 = vld [vmem:[#allocation11 + $0x220] ss:$8 sps:$4 sm:$0xff]  }
 0x312   :  { %761 = vmatprep.subr.bf16.mxu0 %v741_v5  ;;  %1324 = vmatprep.subr.bf16.mxu1 %v741_v5 }
 0x313   :  { %762 = vmatpush1.bf16.msra.mxu0 %v5142_v2 }
 0x314   :  { %841 = vmatprep.subr.bf16.mxu0 %v741_v5  ;;  %v4307_v5 = vld [vmem:[#allocation11 + $0x214] ss:$8 sps:$4 sm:$0xff]  }
 0x316   :  { %3745 = vmatmul.mubr.msk.bf16.vlgmr.msra.gmra.mxu0 %vm743_vm7, %v742_v6  ;;  %v4310_v6 = vld [vmem:[#allocation11 + $0x204] ss:$8 sps:$4 sm:$0xff]  }
 0x317   :  { %842 = vmatpush1.bf16.msra.mxu0 %v5142_v2  ;;  %859 = vmatprep.mubr.bf16.mxu0 %v4941_v18 }
 0x318   :  { %1264 = vmatprep.subr.bf16.mxu0 %v4241_v7  ;;  %v4308_v7 = vld [vmem:[#allocation11 + $0x200] ss:$8 sps:$4 sm:$0xff]  }
 0x31e   :  { %3746 = vmatmul.mubr.msk.bf16.vlgmr.msra.gmra.mxu0 %vm743_vm7, %v823_v8  ;;  %v4313_v8 = vld [vmem:[#allocation11 + $0x2f4] ss:$8 sps:$4 sm:$0xff]  }
 0x31f   :  { %1265 = vmatpush1.bf16.msra.mxu0 %v4239_v9  ;;  %v4311_v9 = vld [vmem:[#allocation11 + $0x2f0] ss:$8 sps:$4 sm:$0xff]  }
 0x320   :  { %1266 = vmatprep.subr.bf16.mxu0 %v4244_v10  ;;  %v4316_v10 = vld [vmem:[#allocation11 + $0x2e4] ss:$8 sps:$4 sm:$0xff]  }
 0x323   :  { %1267 = vmatpush1.bf16.msra.mxu0 %v4242_v11  ;;  %v4314_v11 = vld [vmem:[#allocation11 + $0x2e0] ss:$8 sps:$4 sm:$0xff]  }
 0x324   :  { %1268 = vmatprep.subr.bf16.mxu0 %v4247_v12  ;;  %v4319_v12 = vld [vmem:[#allocation11 + $0x2d4] ss:$8 sps:$4 sm:$0xff]  }
 0x327   :  { %1269 = vmatpush1.bf16.msra.mxu0 %v4245_v13  ;;  %v4317_v13 = vld [vmem:[#allocation11 + $0x2d0] ss:$8 sps:$4 sm:$0xff]  }
 0x328   :  { %1270 = vmatprep.subr.bf16.mxu0 %v4250_v14  ;;  %v4322_v14 = vld [vmem:[#allocation11 + $0x2c4] ss:$8 sps:$4 sm:$0xff]  }
 0x32b   :  { %1271 = vmatpush1.bf16.msra.mxu0 %v4248_v15  ;;  %v4320_v15 = vld [vmem:[#allocation11 + $0x2c0] ss:$8 sps:$4 sm:$0xff]  }
 0x32c   :  { %1272 = vmatprep.subr.bf16.mxu0 %v4253_v16  ;;  %v4325_v16 = vld [vmem:[#allocation11 + $0x2b4] ss:$8 sps:$4 sm:$0xff]  }
 0x32f   :  { %1273 = vmatpush1.bf16.msra.mxu0 %v4251_v17  ;;  %v4323_v17 = vld [vmem:[#allocation11 + $0x2b0] ss:$8 sps:$4 sm:$0xff]  }
 0x330   :  { %1274 = vmatprep.subr.bf16.mxu0 %v4256_v19  ;;  %v4328_v19 = vld [vmem:[#allocation11 + $0x2a4] ss:$8 sps:$4 sm:$0xff]  }
 0x333   :  { %1275 = vmatpush1.bf16.msra.mxu0 %v4254_v20  ;;  %v4326_v20 = vld [vmem:[#allocation11 + $0x2a0] ss:$8 sps:$4 sm:$0xff]  }
 0x334   :  { %1276 = vmatprep.subr.bf16.mxu0 %v4259_v21  ;;  %v4331_v21 = vld [vmem:[#allocation11 + $0x294] ss:$8 sps:$4 sm:$0xff]  }
 0x337   :  { %1277 = vmatpush1.bf16.msra.mxu0 %v4257_v22  ;;  %v4329_v22 = vld [vmem:[#allocation11 + $0x290] ss:$8 sps:$4 sm:$0xff]  }
 0x338   :  { %1278 = vmatprep.subr.bf16.mxu0 %v4262_v23  ;;  %v4334_v23 = vld [vmem:[#allocation11 + $0x284] ss:$8 sps:$4 sm:$0xff]  }
 0x33b   :  { %1279 = vmatpush1.bf16.msra.mxu0 %v4260_v25  ;;  %v4332_v25 = vld [vmem:[#allocation11 + $0x280] ss:$8 sps:$4 sm:$0xff]  }
 0x33c   :  { %1280 = vmatprep.subr.bf16.mxu0 %v4265_v27 }
 0x33f   :  { %1281 = vmatpush2.bf16.msra.mxu0 %v4263_v28 }
 0x340   :  { %1282 = vmatprep.subr.bf16.mxu0 %v4268_v29 }
 0x343   :  { %1283 = vmatpush2.bf16.msra.mxu0 %v4266_v30 }
 0x344   :  { %1284 = vmatprep.subr.bf16.mxu0 %v4271_v31 }
 0x347   :  { %1285 = vmatpush2.bf16.msra.mxu0 %v4269_v32 }
 0x348   :  { %1286 = vmatprep.subr.bf16.mxu0 %v4274_v33 }
 0x34b   :  { %1287 = vmatpush2.bf16.msra.mxu0 %v4272_v34 }
 0x34c   :  { %1288 = vmatprep.subr.bf16.mxu0 %v4277_v35 }
 0x34f   :  { %1289 = vmatpush2.bf16.msra.mxu0 %v4275_v36 }
 0x350   :  { %1290 = vmatprep.subr.bf16.mxu0 %v4280_v37 }
 0x353   :  { %1291 = vmatpush2.bf16.msra.mxu0 %v4278_v38 }
 0x354   :  { %1292 = vmatprep.subr.bf16.mxu0 %v4283_v39 }
 0x357   :  { %1293 = vmatpush2.bf16.msra.mxu0 %v4281_v40 }
 0x358   :  { %1294 = vmatprep.subr.bf16.mxu0 %v4286_v41 }
 0x35b   :  { %1295 = vmatpush2.bf16.msra.mxu0 %v4284_v46 }
 0x35c   :  { %1546 = vmatprep.subr.bf16.mxu0 %v4289_v42  ;;  %v4383_v42 = vld [vmem:[#allocation14 + $0x70] ss:$8 sps:$4 sm:$0xff]  }
 0x3d6   :  { %v781_v47 = vpop.f32.mrf.mxu0 }
 0x3d7   :  { %v788_v50 = vpack.c.bf16 %v781_v47, %v781_v47  ;;  %v4385_v47 = vld [vmem:[#allocation14 + $0x74] ss:$8 sps:$4 sm:$0xff]  }
 0x3d8   :  { %v783_v48 = vpop.f32.mrf.mxu0 }
 0x3d9   :  { %v789_v43 = vpack.c.bf16 %v783_v48, %v783_v48  ;;  %v4388_v48 = vld [vmem:[#allocation14 + $0x64] ss:$8 sps:$4 sm:$0xff]  }
 0x3da   :  { %v785_v51 = vpop.f32.mrf.mxu0 }
 0x3db   :  { %1296 = vmatprep.mubr.bf16.mxu0 %v789_v43  ;;  %v4386_v43 = vld [vmem:[#allocation14 + $0x60] ss:$8 sps:$4 sm:$0xff]   ;;  %v4394_v51 = vld [vmem:[#allocation14 + $0x44] ss:$8 sps:$4 sm:$0xff]  }
 0x3dc   :  { %v786_v44 = vpop.f32.mrf.mxu0  ;;  %1297 = vmatmul.mubr.bf16.vlgmr.msra.gmra.mxu0 %v788_v50  ;;  %v4389_v50 = vld [vmem:[#allocation14 + $0x50] ss:$8 sps:$4 sm:$0xff]  }
 0x3dd   :  { %1547 = vmatpush1.bf16.msra.mxu0 %v4287_v49  ;;  %v4391_v49 = vld [vmem:[#allocation14 + $0x54] ss:$8 sps:$4 sm:$0xff]  }
 0x3de   :  { %v861_v54 = vpop.f32.mrf.mxu0  ;;  %1548 = vmatprep.subr.bf16.mxu0 %v4292_v52  ;;  %v4392_v52 = vld [vmem:[#allocation14 + $0x40] ss:$8 sps:$4 sm:$0xff]   ;;  %v4397_v44 = vld [vmem:[#allocation14 + $0x34] ss:$8 sps:$4 sm:$0xff]  }
 0x3df   :  { %v868_v58 = vpack.c.bf16 %v861_v54, %v861_v54  ;;  %v4400_v54 = vld [vmem:[#allocation14 + $0x24] ss:$8 sps:$4 sm:$0xff]  }
 0x3e0   :  { %v863_v56 = vpop.f32.mrf.mxu0 }
 0x3e1   :  { %v869_v57 = vpack.c.bf16 %v863_v56, %v863_v56  ;;  %1549 = vmatpush1.bf16.msra.mxu0 %v4290_v53  ;;  %v4395_v53 = vld [vmem:[#allocation14 + $0x30] ss:$8 sps:$4 sm:$0xff]   ;;  %v4403_v56 = vld [vmem:[#allocation14 + $0x14] ss:$8 sps:$4 sm:$0xff]  }
 0x3e2   :  { %v865_v45 = vpop.f32.mrf.mxu0  ;;  %1550 = vmatprep.subr.bf16.mxu0 %v4295_v55  ;;  %v4398_v55 = vld [vmem:[#allocation14 + $0x20] ss:$8 sps:$4 sm:$0xff]  }
 0x3e3   :  { %1095 = vmatprep.mubr.bf16.mxu1 %v869_v57  ;;  %v4401_v57 = vld [vmem:[#allocation14 + $0x10] ss:$8 sps:$4 sm:$0xff]   ;;  %v4404_v45 = vld [vmem:[#allocation14] ss:$8 sps:$4 sm:$0xff]  }
 0x3e4   :  { %v866_v61 = vpop.f32.mrf.mxu0  ;;  %1096 = vmatmul.mubr.bf16.vlgmr.msra.gmra.mxu1 %v868_v58  ;;  %v4406_v58 = vld [vmem:[#allocation14 + $0x4] ss:$8 sps:$4 sm:$0xff]  }
 0x3e5   :  { %1325 = vmatpush1.bf16.msra.mxu1 %v5142_v2  ;;  %1342 = vmatprep.mubr.bf16.mxu1 %v4941_v18  ;;  %v4305_v2 = vld [vmem:[#allocation11 + $0x210] ss:$8 sps:$4 sm:$0xff]  }
 0x3e6   :  { %1551 = vmatpush1.bf16.msra.mxu0 %v4293_v59  ;;  %v4409_v59 = vld [vmem:[#allocation14 + $0xf4] ss:$8 sps:$4 sm:$0xff]   ;;  %v4412_v61 = vld [vmem:[#allocation14 + $0xe4] ss:$8 sps:$4 sm:$0xff]  }
 0x3e7   :  { %1552 = vmatprep.subr.bf16.mxu0 %v4298_v60  ;;  %v4407_v60 = vld [vmem:[#allocation14 + $0xf0] ss:$8 sps:$4 sm:$0xff]  }
 0x3ea   :  { %1553 = vmatpush1.bf16.msra.mxu0 %v4296_v62  ;;  %v1589_v62 = vld [vmem:[%s5250_s6] ss:$4 sm:$0x3] }
 0x3eb   :  { %1554 = vmatprep.subr.bf16.mxu0 %v4301_v63  ;;  %v4410_v63 = vld [vmem:[#allocation14 + $0xe0] ss:$8 sps:$4 sm:$0xff]  }
 0x3ec   :  { %3811 = vmatmul.mubr.msk.bf16.vlgmr.msra.gmra.mxu1 %vm743_vm7, %v1306_v0  ;;  %v4415_v0 = vld [vmem:[#allocation14 + $0xd4] ss:$8 sps:$4 sm:$0xff]  }
 0x3ed   :  { %1685 = vmatprep.mubr.bf16.mxu1 %v4941_v18 }
 0x3ee   :  { %1555 = vmatpush1.bf16.msra.mxu0 %v4299_v1  ;;  %v1594_v1 = vrot.slane %v1589_v62, %v5128_v24 }
 0x3ef   :  { %1556 = vmatprep.subr.bf16.mxu0 %v4304_v3 }
 0x3f2   :  { %1557 = vmatpush1.bf16.msra.mxu0 %v4302_v4 }
 0x3f3   :  { %1558 = vmatprep.subr.bf16.mxu0 %v4307_v5  ;;  %v1598_v5 = vrot.slane %v1589_v62, %v5130_v26  ;;  %v4367_v62 = vld [vmem:[#allocation14 + $0x1d4] ss:$8 sps:$4 sm:$0xff]  }
 0x3f6   :  { %1559 = vmatpush1.bf16.msra.mxu0 %v4305_v2  ;;  %v3844_v2 = vld [vmem:[%s5250_s6 + $0x1] ss:$4 sm:$0x3] }
 0x3f7   :  { %1560 = vmatprep.subr.bf16.mxu0 %v4310_v6  ;;  %v4413_v6 = vld [vmem:[#allocation14 + $0xd0] ss:$8 sps:$4 sm:$0xff]  }
 0x3fa   :  { %1561 = vmatpush1.bf16.msra.mxu0 %v4308_v7 }
 0x3fb   :  { %1562 = vmatprep.subr.bf16.mxu0 %v4313_v8  ;;  %v4418_v8 = vld [vmem:[#allocation14 + $0xc4] ss:$8 sps:$4 sm:$0xff]  }
 0x3fe   :  { %1563 = vmatpush2.bf16.msra.mxu0 %v4311_v9 }
 0x3ff   :  { %1564 = vmatprep.subr.bf16.mxu0 %v4316_v10 }
 0x402   :  { %1565 = vmatpush2.bf16.msra.mxu0 %v4314_v11  ;;  %v3845_v11 = vld [vmem:[%s5250_s6 + $0x2] ss:$4 sm:$0x3] }
 0x403   :  { %1566 = vmatprep.subr.bf16.mxu0 %v4319_v12 }
 0x406   :  { %1567 = vmatpush2.bf16.msra.mxu0 %v4317_v13  ;;  %v1615_v13 = vrot.slane %v3844_v2, %v5128_v24 }
 0x407   :  { %1568 = vmatprep.subr.bf16.mxu0 %v4322_v14 }
 0x40a   :  { %1569 = vmatpush2.bf16.msra.mxu0 %v4320_v15 }
 0x40b   :  { %1570 = vmatprep.subr.bf16.mxu0 %v4325_v16  ;;  %v4416_v16 = vld [vmem:[#allocation14 + $0xc0] ss:$8 sps:$4 sm:$0xff]  }
 0x40e   :  { %1571 = vmatpush2.bf16.msra.mxu0 %v4323_v17  ;;  %v1619_v17 = vrot.slane %v3844_v2, %v5130_v26  ;;  %v4374_v2 = vld [vmem:[#allocation14 + $0x1a0] ss:$8 sps:$4 sm:$0xff]  }
 0x40f   :  { %1572 = vmatprep.subr.bf16.mxu0 %v4328_v19 }
 0x412   :  { %1573 = vmatpush2.bf16.msra.mxu0 %v4326_v20  ;;  %v1630_v20 = vrot.slane %v3845_v11, %v5128_v24 }
 0x413   :  { %1574 = vmatprep.subr.bf16.mxu0 %v4331_v21  ;;  %v4421_v21 = vld [vmem:[#allocation14 + $0xb4] ss:$8 sps:$4 sm:$0xff]  }
 0x416   :  { %1575 = vmatpush2.bf16.msra.mxu0 %v4329_v22 }
 0x417   :  { %1576 = vmatprep.subr.bf16.mxu0 %v4334_v23 }
 0x41a   :  { %1577 = vmatpush2.bf16.msra.mxu0 %v4332_v25  ;;  %v1634_v25 = vrot.slane %v3845_v11, %v5130_v26  ;;  %v4428_v11 = vld [vmem:[#allocation14 + $0x80] ss:$8 sps:$4 sm:$0xff]  }
 0x41b   :  { %2170 = vmatprep.subr.bf16.mxu0 %v4385_v47  ;;  %v4340_v47 = vld [vmem:[#allocation14 + $0x164] ss:$8 sps:$4 sm:$0xff]  }
 0x49c   :  { %v1298_v27 = vpop.f32.mrf.mxu0 }
 0x49e   :  { %v1300_v28 = vpop.f32.mrf.mxu0 }
 0x4a0   :  { %v1302_v29 = vpop.f32.mrf.mxu0 }
 0x4a1   :  { %v4419_v29 = vld [vmem:[#allocation14 + $0xb0] ss:$8 sps:$4 sm:$0xff]  }
 0x4a2   :  { %v1303_v30 = vpop.f32.mrf.mxu0 }
 0x4a4   :  { %v1097_v31 = vpop.f32.mrf.mxu1 }
 0x4a5   :  { %v1299_v32 = vadd.f32 %v1298_v27, %v1097_v31 }
 0x4a6   :  { %v1099_v33 = vpop.f32.mrf.mxu1 }
 0x4a7   :  { %v5153_v34 = vadd.f32 %v1300_v28, %v1099_v33 }
 0x4a8   :  { %v1101_v35 = vpop.f32.mrf.mxu1 }
 0x4a9   :  { %v4422_v35 = vld [vmem:[#allocation14 + $0xa0] ss:$8 sps:$4 sm:$0xff]  }
 0x4aa   :  { %v1102_v36 = vpop.f32.mrf.mxu1 }
 0x4ac   :  { %v1344_v37 = vpop.f32.mrf.mxu1 }
 0x4ad   :  { %v1351_v40 = vpack.c.bf16 %v1344_v37, %v1344_v37  ;;  %v4427_v37 = vld [vmem:[#allocation14 + $0x94] ss:$8 sps:$4 sm:$0xff]  }
 0x4ae   :  { %v1346_v38 = vpop.f32.mrf.mxu1 }
 0x4af   :  { %v1352_v39 = vpack.c.bf16 %v1346_v38, %v1346_v38 }
 0x4b0   :  { %v1348_v41 = vpop.f32.mrf.mxu1 }
 0x4b1   :  { %1578 = vmatprep.mubr.bf16.mxu0 %v1352_v39  ;;  %v1641_v39 = vld [vmem:[#allocation13] sm:$0x3] }
 0x4b2   :  { %v1349_v46 = vpop.f32.mrf.mxu1  ;;  %1579 = vmatmul.mubr.bf16.vlgmr.msra.gmra.mxu0 %v1351_v40  ;;  %v4337_v40 = vld [vmem:[#allocation14 + $0x174] ss:$8 sps:$4 sm:$0xff]   ;;  %v4425_v41 = vld [vmem:[#allocation14 + $0x90] ss:$8 sps:$4 sm:$0xff]  }
 0x4b3   :  { %2171 = vmatpush1.bf16.msra.mxu0 %v4383_v42  ;;  %v4335_v46 = vld [vmem:[#allocation14 + $0x170] ss:$8 sps:$4 sm:$0xff]   ;;  %v1729_v42 = vld [vmem:[#allocation13 + $0x2] sm:$0x3] }
 0x4b4   :  { %2172 = vmatprep.subr.bf16.mxu0 %v4388_v48  ;;  %v4338_v48 = vld [vmem:[#allocation14 + $0x160] ss:$8 sps:$4 sm:$0xff]  }
 0x4b7   :  { %2173 = vmatpush1.bf16.msra.mxu0 %v4386_v43  ;;  %v4343_v43 = vld [vmem:[#allocation14 + $0x154] ss:$8 sps:$4 sm:$0xff]  }
 0x4b8   :  { %2174 = vmatprep.subr.bf16.mxu0 %v4391_v49  ;;  %v4341_v49 = vld [vmem:[#allocation14 + $0x150] ss:$8 sps:$4 sm:$0xff]  }
 0x4bb   :  { %2175 = vmatpush1.bf16.msra.mxu0 %v4389_v50  ;;  %v4346_v50 = vld [vmem:[#allocation14 + $0x144] ss:$8 sps:$4 sm:$0xff]  }
 0x4bc   :  { %2176 = vmatprep.subr.bf16.mxu0 %v4394_v51  ;;  %v4344_v51 = vld [vmem:[#allocation14 + $0x140] ss:$8 sps:$4 sm:$0xff]  }
 0x4bf   :  { %2177 = vmatpush1.bf16.msra.mxu0 %v4392_v52  ;;  %v4349_v52 = vld [vmem:[#allocation14 + $0x134] ss:$8 sps:$4 sm:$0xff]  }
 0x4c0   :  { %2178 = vmatprep.subr.bf16.mxu0 %v4397_v44  ;;  %v4347_v44 = vld [vmem:[#allocation14 + $0x130] ss:$8 sps:$4 sm:$0xff]  }
 0x4c3   :  { %2179 = vmatpush1.bf16.msra.mxu0 %v4395_v53  ;;  %v4352_v53 = vld [vmem:[#allocation14 + $0x124] ss:$8 sps:$4 sm:$0xff]  }
 0x4c4   :  { %2180 = vmatprep.subr.bf16.mxu0 %v4400_v54  ;;  %v4350_v54 = vld [vmem:[#allocation14 + $0x120] ss:$8 sps:$4 sm:$0xff]  }
 0x4c7   :  { %2181 = vmatpush1.bf16.msra.mxu0 %v4398_v55  ;;  %v4355_v55 = vld [vmem:[#allocation14 + $0x114] ss:$8 sps:$4 sm:$0xff]  }
 0x4c8   :  { %2182 = vmatprep.subr.bf16.mxu0 %v4403_v56  ;;  %v4353_v56 = vld [vmem:[#allocation14 + $0x110] ss:$8 sps:$4 sm:$0xff]  }
 0x4cb   :  { %2183 = vmatpush1.bf16.msra.mxu0 %v4401_v57  ;;  %v4358_v57 = vld [vmem:[#allocation14 + $0x104] ss:$8 sps:$4 sm:$0xff]  }
 0x4cc   :  { %2184 = vmatprep.subr.bf16.mxu0 %v4406_v58  ;;  %v4356_v58 = vld [vmem:[#allocation14 + $0x100] ss:$8 sps:$4 sm:$0xff]  }
 0x4cf   :  { %2185 = vmatpush1.bf16.msra.mxu0 %v4404_v45  ;;  %v4361_v45 = vld [vmem:[#allocation14 + $0x1f4] ss:$8 sps:$4 sm:$0xff]  }
 0x4d0   :  { %2186 = vmatprep.subr.bf16.mxu0 %v4409_v59  ;;  %v4359_v59 = vld [vmem:[#allocation14 + $0x1f0] ss:$8 sps:$4 sm:$0xff]  }
 0x4d3   :  { %2187 = vmatpush2.bf16.msra.mxu0 %v4407_v60  ;;  %v4364_v60 = vld [vmem:[#allocation14 + $0x1e4] ss:$8 sps:$4 sm:$0xff]  }
 0x4d4   :  { %2188 = vmatprep.subr.bf16.mxu0 %v4412_v61  ;;  %v4362_v61 = vld [vmem:[#allocation14 + $0x1e0] ss:$8 sps:$4 sm:$0xff]  }
 0x4d7   :  { %2189 = vmatpush2.bf16.msra.mxu0 %v4410_v63  ;;  %v4365_v63 = vld [vmem:[#allocation14 + $0x1d0] ss:$8 sps:$4 sm:$0xff]  }
 0x4d8   :  { %2190 = vmatprep.subr.bf16.mxu0 %v4415_v0  ;;  %v4370_v0 = vld [vmem:[#allocation14 + $0x1c4] ss:$8 sps:$4 sm:$0xff]  }
 0x4db   :  { %2191 = vmatpush2.bf16.msra.mxu0 %v4413_v6  ;;  %v4379_v6 = vld [vmem:[#allocation14 + $0x194] ss:$8 sps:$4 sm:$0xff]  }
 0x4dc   :  { %2192 = vmatprep.subr.bf16.mxu0 %v4418_v8  ;;  %v4382_v8 = vld [vmem:[#allocation14 + $0x184] ss:$8 sps:$4 sm:$0xff]  }
 0x4df   :  { %2193 = vmatpush2.bf16.msra.mxu0 %v4416_v16 }
 0x4e0   :  { %2194 = vmatprep.subr.bf16.mxu0 %v4421_v21 }
 0x4e3   :  { %2195 = vmatpush2.bf16.msra.mxu0 %v4419_v29  ;;  %v4431_v29 = vld [vmem:[#allocation14 + $0x270] ss:$8 sps:$4 sm:$0xff]  }
 0x572   :  { %v1580_v3 = vpop.f32.mrf.mxu0 }
 0x573   :  { %v1587_v4 = vadd.f32 %v1580_v3, %v1299_v32  ;;  %v4424_v32 = vld [vmem:[#allocation14 + $0xa4] ss:$8 sps:$4 sm:$0xff]   ;;  %v4373_v3 = vld [vmem:[#allocation14 + $0x1b4] ss:$8 sps:$4 sm:$0xff]  }
 0x574   :  { %v1582_v7 = vpop.f32.mrf.mxu0  ;;  %2196 = vmatprep.subr.bf16.mxu0 %v4424_v32  ;;  %v4439_v32 = vld [vmem:[#allocation14 + $0x254] ss:$8 sps:$4 sm:$0xff]  }
 0x575   :  { %v1601_v9 = vadd.f32 %v1594_v1, %v1587_v4  ;;  %v1588_v10 = vadd.f32 %v1582_v7, %v5153_v34  ;;  %2197 = vmatpush2.bf16.msra.mxu0 %v4422_v35  ;;  %v4368_v1 = vld [vmem:[#allocation14 + $0x1c0] ss:$8 sps:$4 sm:$0xff]   ;;  %v4371_v4 = vld [vmem:[#allocation14 + $0x1b0] ss:$8 sps:$4 sm:$0xff]  }
 0x576   :  { %v1584_v12 = vpop.f32.mrf.mxu0  ;;  %2198 = vmatprep.subr.bf16.mxu0 %v4427_v37  ;;  %v4377_v7 = vld [vmem:[#allocation14 + $0x190] ss:$8 sps:$4 sm:$0xff]   ;;  %v4440_v35 = vld [vmem:[#allocation14 + $0x240] ss:$8 sps:$4 sm:$0xff]  }
 0x577   :  { %vm1603_vm8 = vcmp.ge.f32.partialorder %v1601_v9, 0.0  ;;  %v1605_v14 = vmul.f32 0.2, %v1601_v9  ;;  %v1602_v15 = vadd.f32 %v1598_v5, %v1588_v10  ;;  %v4376_v5 = vld [vmem:[#allocation14 + $0x1a4] ss:$8 sps:$4 sm:$0xff]  }
 0x578   :  { %v1585_v19 = vpop.f32.mrf.mxu0  ;;  %v4430_v10 = vld [vmem:[#allocation14 + $0x84] ss:$8 sps:$4 sm:$0xff]   ;;  %v4443_v37 = vld [vmem:[#allocation14 + $0x230] ss:$8 sps:$4 sm:$0xff]  }
 0x579   :  { %v1607_v22 = vsel %vm1603_vm8, %v1601_v9, %v1605_v14  ;;  %vm1604_vm9 = vcmp.ge.f32.partialorder %v1602_v15, 0.0  ;;  %v1606_v23 = vmul.f32 0.2, %v1602_v15  ;;  %2199 = vmatpush2.bf16.msra.mxu0 %v4425_v41  ;;  %v4380_v9 = vld [vmem:[#allocation14 + $0x180] ss:$8 sps:$4 sm:$0xff]  }
 0x57a   :  { %v1622_v27 = vmul.f32 %v1615_v13, %v1607_v22  ;;  %2200 = vmatprep.subr.bf16.mxu0 %v4430_v10  ;;  %v4449_v41 = vld [vmem:[#allocation14 + $0x210] ss:$8 sps:$4 sm:$0xff]  }
 0x57b   :  { %v1608_v28 = vsel %vm1604_vm9, %v1602_v15, %v1606_v23 }
 0x57c   :  { %v1623_v30 = vmul.f32 %v1619_v17, %v1608_v28  ;;  %v1637_v31 = vadd.f32 %v1630_v20, %v1622_v27  ;;  %v2212_v28 = vld [vmem:[#allocation13 + $0x4] sm:$0x3] }
 0x57d   :  { %2201 = vmatpush2.bf16.msra.mxu0 %v4428_v11 }
 0x57e   :  { %v1638_v33 = vadd.f32 %v1634_v25, %v1623_v30  ;;  %v1639_v34 = vpack.c.bf16 %v1637_v31, %v1637_v31  ;;  %v4433_v25 = vld [vmem:[#allocation14 + $0x274] ss:$8 sps:$4 sm:$0xff]   ;;  %v4436_v30 = vld [vmem:[#allocation14 + $0x264] ss:$8 sps:$4 sm:$0xff]   ;;  %v4434_v31 = vld [vmem:[#allocation14 + $0x260] ss:$8 sps:$4 sm:$0xff]  }
 0x580   :  { %v5171_v36 = vpack.c.bf16 %v1638_v33, %v1638_v33  ;;  %v5176_v38 = vsel %vm1646_vm10, %v1639_v34, 0  ;;  %v4437_v33 = vld [vmem:[#allocation14 + $0x250] ss:$8 sps:$4 sm:$0xff]   ;;  %v4442_v34 = vld [vmem:[#allocation14 + $0x244] ss:$8 sps:$4 sm:$0xff]  }
 0x582   :  { %3846 = vmatprep.subr.msk.bf16.mxu1 %vm1646_vm10, %v5171_v36 }
 0x583   :  { %1668 = vmatpush1.bf16.msra.mxu1 %v5176_v38 }
 0x584   :  { %3848 = vmatprep.subr.msk.bf16.mxu1 %vm1646_vm10, %v5171_v36 }
 0x586   :  { %3847 = vmatmul.mubr.msk.bf16.vlgmr.msra.gmra.mxu1 %vm1642_vm11, %v1641_v39  ;;  %v4446_v39 = vld [vmem:[#allocation14 + $0x220] ss:$8 sps:$4 sm:$0xff]  }
 0x587   :  { %1748 = vmatpush1.bf16.msra.mxu1 %v5176_v38  ;;  %1765 = vmatprep.mubr.bf16.mxu1 %v4941_v18 }
 0x588   :  { %1969 = vmatprep.subr.bf16.mxu1 %v4337_v40  ;;  %v4451_v40 = vld [vmem:[#allocation14 + $0x214] ss:$8 sps:$4 sm:$0xff]  }
 0x58e   :  { %3849 = vmatmul.mubr.msk.bf16.vlgmr.msra.gmra.mxu1 %vm1642_vm11, %v1729_v42  ;;  %v4452_v42 = vld [vmem:[#allocation14 + $0x200] ss:$8 sps:$4 sm:$0xff]  }
 0x58f   :  { %1970 = vmatpush1.bf16.msra.mxu1 %v4335_v46  ;;  %v4454_v46 = vld [vmem:[#allocation14 + $0x204] ss:$8 sps:$4 sm:$0xff]  }
 0x590   :  { %1971 = vmatprep.subr.bf16.mxu1 %v4340_v47  ;;  %v4457_v47 = vld [vmem:[#allocation14 + $0x2f4] ss:$8 sps:$4 sm:$0xff]  }
 0x593   :  { %1972 = vmatpush1.bf16.msra.mxu1 %v4338_v48  ;;  %v4455_v48 = vld [vmem:[#allocation14 + $0x2f0] ss:$8 sps:$4 sm:$0xff]  }
 0x594   :  { %1973 = vmatprep.subr.bf16.mxu1 %v4343_v43  ;;  %v4460_v43 = vld [vmem:[#allocation14 + $0x2e4] ss:$8 sps:$4 sm:$0xff]  }
 0x597   :  { %1974 = vmatpush1.bf16.msra.mxu1 %v4341_v49  ;;  %v4458_v49 = vld [vmem:[#allocation14 + $0x2e0] ss:$8 sps:$4 sm:$0xff]  }
 0x598   :  { %1975 = vmatprep.subr.bf16.mxu1 %v4346_v50  ;;  %v4463_v50 = vld [vmem:[#allocation14 + $0x2d4] ss:$8 sps:$4 sm:$0xff]  }
 0x59b   :  { %1976 = vmatpush1.bf16.msra.mxu1 %v4344_v51  ;;  %v4461_v51 = vld [vmem:[#allocation14 + $0x2d0] ss:$8 sps:$4 sm:$0xff]  }
 0x59c   :  { %1977 = vmatprep.subr.bf16.mxu1 %v4349_v52  ;;  %v4466_v52 = vld [vmem:[#allocation14 + $0x2c4] ss:$8 sps:$4 sm:$0xff]  }
 0x59f   :  { %1978 = vmatpush1.bf16.msra.mxu1 %v4347_v44  ;;  %v4464_v44 = vld [vmem:[#allocation14 + $0x2c0] ss:$8 sps:$4 sm:$0xff]  }
 0x5a0   :  { %1979 = vmatprep.subr.bf16.mxu1 %v4352_v53  ;;  %v4469_v53 = vld [vmem:[#allocation14 + $0x2b4] ss:$8 sps:$4 sm:$0xff]  }
 0x5a3   :  { %1980 = vmatpush1.bf16.msra.mxu1 %v4350_v54  ;;  %v4467_v54 = vld [vmem:[#allocation14 + $0x2b0] ss:$8 sps:$4 sm:$0xff]  }
 0x5a4   :  { %1981 = vmatprep.subr.bf16.mxu1 %v4355_v55  ;;  %v4472_v55 = vld [vmem:[#allocation14 + $0x2a4] ss:$8 sps:$4 sm:$0xff]  }
 0x5a7   :  { %1982 = vmatpush1.bf16.msra.mxu1 %v4353_v56  ;;  %v4470_v56 = vld [vmem:[#allocation14 + $0x2a0] ss:$8 sps:$4 sm:$0xff]  }
 0x5a8   :  { %1983 = vmatprep.subr.bf16.mxu1 %v4358_v57  ;;  %v4475_v57 = vld [vmem:[#allocation14 + $0x294] ss:$8 sps:$4 sm:$0xff]  }
 0x5ab   :  { %1984 = vmatpush1.bf16.msra.mxu1 %v4356_v58  ;;  %v4473_v58 = vld [vmem:[#allocation14 + $0x290] ss:$8 sps:$4 sm:$0xff]  }
 0x5ac   :  { %1985 = vmatprep.subr.bf16.mxu1 %v4361_v45  ;;  %v4478_v45 = vld [vmem:[#allocation14 + $0x284] ss:$8 sps:$4 sm:$0xff]  }
 0x5af   :  { %1986 = vmatpush2.bf16.msra.mxu1 %v4359_v59  ;;  %v4476_v59 = vld [vmem:[#allocation14 + $0x280] ss:$8 sps:$4 sm:$0xff]  }
 0x5b0   :  { %1987 = vmatprep.subr.bf16.mxu1 %v4364_v60 }
 0x5b3   :  { %1988 = vmatpush2.bf16.msra.mxu1 %v4362_v61 }
 0x5b4   :  { %1989 = vmatprep.subr.bf16.mxu1 %v4367_v62 }
 0x5b7   :  { %1990 = vmatpush2.bf16.msra.mxu1 %v4365_v63 }
 0x5b8   :  { %1991 = vmatprep.subr.bf16.mxu1 %v4370_v0 }
 0x5bb   :  { %1992 = vmatpush2.bf16.msra.mxu1 %v4368_v1 }
 0x5bc   :  { %1993 = vmatprep.subr.bf16.mxu1 %v4373_v3 }
 0x5bf   :  { %1994 = vmatpush2.bf16.msra.mxu1 %v4371_v4 }
 0x5c0   :  { %1995 = vmatprep.subr.bf16.mxu1 %v4376_v5 }
 0x5c3   :  { %1996 = vmatpush2.bf16.msra.mxu1 %v4374_v2 }
 0x5c4   :  { %1997 = vmatprep.subr.bf16.mxu1 %v4379_v6 }
 0x5c7   :  { %1998 = vmatpush2.bf16.msra.mxu1 %v4377_v7 }
 0x5c8   :  { %1999 = vmatprep.subr.bf16.mxu1 %v4382_v8 }
 0x5cb   :  { %2000 = vmatpush2.bf16.msra.mxu1 %v4380_v9 }
 0x5cc   :  { %3914 = vmatprep.subr.msk.bf16.mxu1 %vm1646_vm10, %v5171_v36  ;;  %v4445_v36 = vld [vmem:[#allocation14 + $0x234] ss:$8 sps:$4 sm:$0xff]  }
 0x646   :  { %v1687_v12 = vpop.f32.mrf.mxu1 }
 0x647   :  { %v1694_v15 = vpack.c.bf16 %v1687_v12, %v1687_v12  ;;  %v4527_v12 = vld [vmem:[#allocation17 + $0x70] ss:$8 sps:$4 sm:$0xff]  }
 0x648   :  { %v1689_v13 = vpop.f32.mrf.mxu1 }
 0x649   :  { %v1695_v14 = vpack.c.bf16 %v1689_v13, %v1689_v13  ;;  %v4529_v13 = vld [vmem:[#allocation17 + $0x74] ss:$8 sps:$4 sm:$0xff]  }
 0x64a   :  { %v1691_v16 = vpop.f32.mrf.mxu1 }
 0x64b   :  { %2202 = vmatprep.mubr.bf16.mxu0 %v1695_v14  ;;  %v4532_v14 = vld [vmem:[#allocation17 + $0x64] ss:$8 sps:$4 sm:$0xff]   ;;  %v4535_v16 = vld [vmem:[#allocation17 + $0x54] ss:$8 sps:$4 sm:$0xff]  }
 0x64c   :  { %v1692_v17 = vpop.f32.mrf.mxu1  ;;  %2203 = vmatmul.mubr.bf16.vlgmr.msra.gmra.mxu0 %v1694_v15  ;;  %v4530_v15 = vld [vmem:[#allocation17 + $0x60] ss:$8 sps:$4 sm:$0xff]  }
 0x64d   :  { %2591 = vmatprep.mubr.bf16.mxu0 %v4941_v18  ;;  %v4533_v17 = vld [vmem:[#allocation17 + $0x50] ss:$8 sps:$4 sm:$0xff]  }
 0x64e   :  { %v1767_v19 = vpop.f32.mrf.mxu1 }
 0x64f   :  { %v1774_v22 = vpack.c.bf16 %v1767_v19, %v1767_v19  ;;  %v4538_v19 = vld [vmem:[#allocation17 + $0x44] ss:$8 sps:$4 sm:$0xff]  }
 0x650   :  { %v1769_v20 = vpop.f32.mrf.mxu1 }
 0x651   :  { %v1775_v21 = vpack.c.bf16 %v1769_v20, %v1769_v20  ;;  %v4536_v20 = vld [vmem:[#allocation17 + $0x40] ss:$8 sps:$4 sm:$0xff]  }
 0x652   :  { %v1771_v23 = vpop.f32.mrf.mxu1 }
 0x653   :  { %2001 = vmatprep.mubr.bf16.mxu1 %v1775_v21  ;;  %v4541_v21 = vld [vmem:[#allocation17 + $0x34] ss:$8 sps:$4 sm:$0xff]   ;;  %v4544_v23 = vld [vmem:[#allocation17 + $0x24] ss:$8 sps:$4 sm:$0xff]  }
 0x654   :  { %v1772_v27 = vpop.f32.mrf.mxu1  ;;  %2002 = vmatmul.mubr.bf16.vlgmr.msra.gmra.mxu1 %v1774_v22  ;;  %v4539_v22 = vld [vmem:[#allocation17 + $0x30] ss:$8 sps:$4 sm:$0xff]  }
 0x655   :  { %2231 = vmatpush1.bf16.msra.mxu1 %v5176_v38  ;;  %2248 = vmatprep.mubr.bf16.mxu1 %v4941_v18  ;;  %v4448_v38 = vld [vmem:[#allocation14 + $0x224] ss:$8 sps:$4 sm:$0xff]   ;;  %v4547_v27 = vld [vmem:[#allocation17 + $0x14] ss:$8 sps:$4 sm:$0xff]  }
 0x656   :  { %2452 = vmatprep.subr.bf16.mxu1 %v4433_v25  ;;  %v4542_v25 = vld [vmem:[#allocation17 + $0x20] ss:$8 sps:$4 sm:$0xff]  }
 0x65c   :  { %3915 = vmatmul.mubr.msk.bf16.vlgmr.msra.gmra.mxu1 %vm1642_vm11, %v2212_v28  ;;  %v4545_v28 = vld [vmem:[#allocation17 + $0x10] ss:$8 sps:$4 sm:$0xff]  }
 0x65d   :  { %2453 = vmatpush1.bf16.msra.mxu1 %v4431_v29  ;;  %v4550_v29 = vld [vmem:[#allocation17 + $0x4] ss:$8 sps:$4 sm:$0xff]  }
 0x65e   :  { %2454 = vmatprep.subr.bf16.mxu1 %v4436_v30  ;;  %v4548_v30 = vld [vmem:[#allocation17] ss:$8 sps:$4 sm:$0xff]  }
 0x661   :  { %2455 = vmatpush1.bf16.msra.mxu1 %v4434_v31  ;;  %v4553_v31 = vld [vmem:[#allocation17 + $0xf4] ss:$8 sps:$4 sm:$0xff]  }
 0x662   :  { %2456 = vmatprep.subr.bf16.mxu1 %v4439_v32  ;;  %v4551_v32 = vld [vmem:[#allocation17 + $0xf0] ss:$8 sps:$4 sm:$0xff]  }
 0x665   :  { %2457 = vmatpush1.bf16.msra.mxu1 %v4437_v33  ;;  %v4556_v33 = vld [vmem:[#allocation17 + $0xe4] ss:$8 sps:$4 sm:$0xff]  }
 0x666   :  { %2458 = vmatprep.subr.bf16.mxu1 %v4442_v34  ;;  %v2495_v34 = vld [vmem:[%s5253_s9] ss:$4 sm:$0x3] }
 0x669   :  { %2459 = vmatpush1.bf16.msra.mxu1 %v4440_v35  ;;  %v4554_v35 = vld [vmem:[#allocation17 + $0xe0] ss:$8 sps:$4 sm:$0xff]  }
 0x66a   :  { %2460 = vmatprep.subr.bf16.mxu1 %v4445_v36  ;;  %v4559_v36 = vld [vmem:[#allocation17 + $0xd4] ss:$8 sps:$4 sm:$0xff]  }
 0x66d   :  { %2461 = vmatpush1.bf16.msra.mxu1 %v4443_v37  ;;  %v2500_v37 = vrot.slane %v2495_v34, %v5128_v24 }
 0x66e   :  { %2462 = vmatprep.subr.bf16.mxu1 %v4448_v38 }
 0x671   :  { %2463 = vmatpush1.bf16.msra.mxu1 %v4446_v39 }
 0x672   :  { %2464 = vmatprep.subr.bf16.mxu1 %v4451_v40  ;;  %v2504_v40 = vrot.slane %v2495_v34, %v5130_v26  ;;  %v4511_v34 = vld [vmem:[#allocation17 + $0x1d4] ss:$8 sps:$4 sm:$0xff]  }
 0x675   :  { %2465 = vmatpush1.bf16.msra.mxu1 %v4449_v41  ;;  %v3948_v41 = vld [vmem:[%s5253_s9 + $0x1] ss:$4 sm:$0x3] }
 0x676   :  { %2466 = vmatprep.subr.bf16.mxu1 %v4454_v46  ;;  %v4557_v46 = vld [vmem:[#allocation17 + $0xd0] ss:$8 sps:$4 sm:$0xff]  }
 0x679   :  { %2467 = vmatpush1.bf16.msra.mxu1 %v4452_v42 }
 0x67a   :  { %2468 = vmatprep.subr.bf16.mxu1 %v4457_v47  ;;  %v4562_v47 = vld [vmem:[#allocation17 + $0xc4] ss:$8 sps:$4 sm:$0xff]  }
 0x67d   :  { %2469 = vmatpush2.bf16.msra.mxu1 %v4455_v48 }
 0x67e   :  { %2470 = vmatprep.subr.bf16.mxu1 %v4460_v43 }
 0x681   :  { %2471 = vmatpush2.bf16.msra.mxu1 %v4458_v49  ;;  %v3949_v49 = vld [vmem:[%s5253_s9 + $0x2] ss:$4 sm:$0x3] }
 0x682   :  { %2472 = vmatprep.subr.bf16.mxu1 %v4463_v50 }
 0x685   :  { %2473 = vmatpush2.bf16.msra.mxu1 %v4461_v51  ;;  %v2521_v51 = vrot.slane %v3948_v41, %v5128_v24 }
 0x686   :  { %2474 = vmatprep.subr.bf16.mxu1 %v4466_v52 }
 0x689   :  { %2475 = vmatpush2.bf16.msra.mxu1 %v4464_v44 }
 0x68a   :  { %2476 = vmatprep.subr.bf16.mxu1 %v4469_v53  ;;  %v4560_v53 = vld [vmem:[#allocation17 + $0xc0] ss:$8 sps:$4 sm:$0xff]  }
 0x68d   :  { %2477 = vmatpush2.bf16.msra.mxu1 %v4467_v54  ;;  %v2525_v54 = vrot.slane %v3948_v41, %v5130_v26  ;;  %v4518_v41 = vld [vmem:[#allocation17 + $0x1a0] ss:$8 sps:$4 sm:$0xff]  }
 0x68e   :  { %2478 = vmatprep.subr.bf16.mxu1 %v4472_v55 }
 0x691   :  { %2479 = vmatpush2.bf16.msra.mxu1 %v4470_v56  ;;  %v2536_v56 = vrot.slane %v3949_v49, %v5128_v24 }
 0x692   :  { %2480 = vmatprep.subr.bf16.mxu1 %v4475_v57  ;;  %v4565_v57 = vld [vmem:[#allocation17 + $0xb4] ss:$8 sps:$4 sm:$0xff]  }
 0x695   :  { %2481 = vmatpush2.bf16.msra.mxu1 %v4473_v58 }
 0x696   :  { %2482 = vmatprep.subr.bf16.mxu1 %v4478_v45 }
 0x699   :  { %2483 = vmatpush2.bf16.msra.mxu1 %v4476_v59  ;;  %v2540_v59 = vrot.slane %v3949_v49, %v5130_v26  ;;  %v4572_v49 = vld [vmem:[#allocation17 + $0x80] ss:$8 sps:$4 sm:$0xff]  }
 0x69a   :  { %3076 = vmatprep.subr.bf16.mxu1 %v4529_v13  ;;  %v4484_v13 = vld [vmem:[#allocation17 + $0x164] ss:$8 sps:$4 sm:$0xff]  }
 0x70c   :  { %v2204_v60 = vpop.f32.mrf.mxu0 }
 0x70e   :  { %v2206_v61 = vpop.f32.mrf.mxu0 }
 0x710   :  { %v2208_v62 = vpop.f32.mrf.mxu0 }
 0x711   :  { %v4563_v62 = vld [vmem:[#allocation17 + $0xb0] ss:$8 sps:$4 sm:$0xff]  }
 0x712   :  { %v2209_v63 = vpop.f32.mrf.mxu0 }
 0x714   :  { %v2003_v0 = vpop.f32.mrf.mxu1 }
 0x715   :  { %v2205_v1 = vadd.f32 %v2204_v60, %v2003_v0 }
 0x716   :  { %v2005_v3 = vpop.f32.mrf.mxu1 }
 0x717   :  { %v5191_v4 = vadd.f32 %v2206_v61, %v2005_v3 }
 0x718   :  { %v2007_v5 = vpop.f32.mrf.mxu1 }
 0x719   :  { %v4566_v5 = vld [vmem:[#allocation17 + $0xa0] ss:$8 sps:$4 sm:$0xff]  }
 0x71a   :  { %v2008_v2 = vpop.f32.mrf.mxu1 }
 0x71c   :  { %v2250_v6 = vpop.f32.mrf.mxu1 }
 0x71d   :  { %v2257_v9 = vpack.c.bf16 %v2250_v6, %v2250_v6  ;;  %v4571_v6 = vld [vmem:[#allocation17 + $0x94] ss:$8 sps:$4 sm:$0xff]  }
 0x71e   :  { %v2252_v7 = vpop.f32.mrf.mxu1 }
 0x71f   :  { %v2258_v8 = vpack.c.bf16 %v2252_v7, %v2252_v7 }
 0x720   :  { %v2254_v10 = vpop.f32.mrf.mxu1 }
 0x721   :  { %2484 = vmatprep.mubr.bf16.mxu1 %v2258_v8  ;;  %v2547_v8 = vld [vmem:[#allocation16] sm:$0x1]  ;;  %v4569_v10 = vld [vmem:[#allocation17 + $0x90] ss:$8 sps:$4 sm:$0xff]  }
 0x722   :  { %v2255_v11 = vpop.f32.mrf.mxu1  ;;  %2485 = vmatmul.mubr.bf16.vlgmr.msra.gmra.mxu1 %v2257_v9  ;;  %v4481_v9 = vld [vmem:[#allocation17 + $0x174] ss:$8 sps:$4 sm:$0xff]  }
 0x723   :  { %3077 = vmatpush1.bf16.msra.mxu1 %v4527_v12  ;;  %v4479_v11 = vld [vmem:[#allocation17 + $0x170] ss:$8 sps:$4 sm:$0xff]   ;;  %v2635_v12 = vld [vmem:[#allocation16 + $0x1] sm:$0x1] }
 0x724   :  { %3078 = vmatprep.subr.bf16.mxu1 %v4532_v14  ;;  %v4482_v14 = vld [vmem:[#allocation17 + $0x160] ss:$8 sps:$4 sm:$0xff]  }
 0x727   :  { %3079 = vmatpush1.bf16.msra.mxu1 %v4530_v15  ;;  %v4487_v15 = vld [vmem:[#allocation17 + $0x154] ss:$8 sps:$4 sm:$0xff]  }
 0x728   :  { %3080 = vmatprep.subr.bf16.mxu1 %v4535_v16  ;;  %v4485_v16 = vld [vmem:[#allocation17 + $0x150] ss:$8 sps:$4 sm:$0xff]  }
 0x72b   :  { %3081 = vmatpush1.bf16.msra.mxu1 %v4533_v17  ;;  %v4490_v17 = vld [vmem:[#allocation17 + $0x144] ss:$8 sps:$4 sm:$0xff]  }
 0x72c   :  { %3082 = vmatprep.subr.bf16.mxu1 %v4538_v19  ;;  %v4488_v19 = vld [vmem:[#allocation17 + $0x140] ss:$8 sps:$4 sm:$0xff]  }
 0x72f   :  { %3083 = vmatpush1.bf16.msra.mxu1 %v4536_v20  ;;  %v4493_v20 = vld [vmem:[#allocation17 + $0x134] ss:$8 sps:$4 sm:$0xff]  }
 0x730   :  { %3084 = vmatprep.subr.bf16.mxu1 %v4541_v21  ;;  %v4491_v21 = vld [vmem:[#allocation17 + $0x130] ss:$8 sps:$4 sm:$0xff]  }
 0x733   :  { %3085 = vmatpush1.bf16.msra.mxu1 %v4539_v22  ;;  %v4496_v22 = vld [vmem:[#allocation17 + $0x124] ss:$8 sps:$4 sm:$0xff]  }
 0x734   :  { %3086 = vmatprep.subr.bf16.mxu1 %v4544_v23  ;;  %v4494_v23 = vld [vmem:[#allocation17 + $0x120] ss:$8 sps:$4 sm:$0xff]  }
 0x737   :  { %3087 = vmatpush1.bf16.msra.mxu1 %v4542_v25  ;;  %v4499_v25 = vld [vmem:[#allocation17 + $0x114] ss:$8 sps:$4 sm:$0xff]  }
 0x738   :  { %3088 = vmatprep.subr.bf16.mxu1 %v4547_v27  ;;  %v4497_v27 = vld [vmem:[#allocation17 + $0x110] ss:$8 sps:$4 sm:$0xff]  }
 0x73b   :  { %3089 = vmatpush1.bf16.msra.mxu1 %v4545_v28  ;;  %v4502_v28 = vld [vmem:[#allocation17 + $0x104] ss:$8 sps:$4 sm:$0xff]  }
 0x73c   :  { %3090 = vmatprep.subr.bf16.mxu1 %v4550_v29  ;;  %v4500_v29 = vld [vmem:[#allocation17 + $0x100] ss:$8 sps:$4 sm:$0xff]  }
 0x73f   :  { %3091 = vmatpush1.bf16.msra.mxu1 %v4548_v30  ;;  %v4505_v30 = vld [vmem:[#allocation17 + $0x1f4] ss:$8 sps:$4 sm:$0xff]  }
 0x740   :  { %3092 = vmatprep.subr.bf16.mxu1 %v4553_v31  ;;  %v4503_v31 = vld [vmem:[#allocation17 + $0x1f0] ss:$8 sps:$4 sm:$0xff]  }
 0x743   :  { %3093 = vmatpush2.bf16.msra.mxu1 %v4551_v32  ;;  %v4508_v32 = vld [vmem:[#allocation17 + $0x1e4] ss:$8 sps:$4 sm:$0xff]  }
 0x744   :  { %3094 = vmatprep.subr.bf16.mxu1 %v4556_v33  ;;  %v4506_v33 = vld [vmem:[#allocation17 + $0x1e0] ss:$8 sps:$4 sm:$0xff]  }
 0x747   :  { %3095 = vmatpush2.bf16.msra.mxu1 %v4554_v35  ;;  %v4509_v35 = vld [vmem:[#allocation17 + $0x1d0] ss:$8 sps:$4 sm:$0xff]  }
 0x748   :  { %3096 = vmatprep.subr.bf16.mxu1 %v4559_v36  ;;  %v4514_v36 = vld [vmem:[#allocation17 + $0x1c4] ss:$8 sps:$4 sm:$0xff]  }
 0x74b   :  { %3097 = vmatpush2.bf16.msra.mxu1 %v4557_v46  ;;  %v4523_v46 = vld [vmem:[#allocation17 + $0x194] ss:$8 sps:$4 sm:$0xff]  }
 0x74c   :  { %3098 = vmatprep.subr.bf16.mxu1 %v4562_v47  ;;  %v4526_v47 = vld [vmem:[#allocation17 + $0x184] ss:$8 sps:$4 sm:$0xff]  }
 0x74f   :  { %3099 = vmatpush2.bf16.msra.mxu1 %v4560_v53 }
 0x750   :  { %3100 = vmatprep.subr.bf16.mxu1 %v4565_v57 }
 0x753   :  { %3101 = vmatpush2.bf16.msra.mxu1 %v4563_v62  ;;  %v4575_v62 = vld [vmem:[#allocation17 + $0x270] ss:$8 sps:$4 sm:$0xff]  }
 0x7e2   :  { %v2486_v38 = vpop.f32.mrf.mxu1 }
 0x7e3   :  { %v2493_v39 = vadd.f32 %v2486_v38, %v2205_v1  ;;  %v4568_v1 = vld [vmem:[#allocation17 + $0xa4] ss:$8 sps:$4 sm:$0xff]   ;;  %v4517_v38 = vld [vmem:[#allocation17 + $0x1b4] ss:$8 sps:$4 sm:$0xff]  }
 0x7e4   :  { %v2488_v42 = vpop.f32.mrf.mxu1  ;;  %3102 = vmatprep.subr.bf16.mxu1 %v4568_v1  ;;  %v4583_v1 = vld [vmem:[#allocation17 + $0x254] ss:$8 sps:$4 sm:$0xff]  }
 0x7e5   :  { %v2507_v48 = vadd.f32 %v2500_v37, %v2493_v39  ;;  %v2494_v43 = vadd.f32 %v2488_v42, %v5191_v4  ;;  %3103 = vmatpush2.bf16.msra.mxu1 %v4566_v5  ;;  %v4512_v37 = vld [vmem:[#allocation17 + $0x1c0] ss:$8 sps:$4 sm:$0xff]   ;;  %v4515_v39 = vld [vmem:[#allocation17 + $0x1b0] ss:$8 sps:$4 sm:$0xff]  }
 0x7e6   :  { %v2490_v50 = vpop.f32.mrf.mxu1  ;;  %3104 = vmatprep.subr.bf16.mxu1 %v4571_v6  ;;  %v4521_v42 = vld [vmem:[#allocation17 + $0x190] ss:$8 sps:$4 sm:$0xff]   ;;  %v4584_v5 = vld [vmem:[#allocation17 + $0x240] ss:$8 sps:$4 sm:$0xff]   ;;  %v4592_v6 = vld [vmem:[#allocation17 + $0x224] ss:$8 sps:$4 sm:$0xff]  }
 0x7e7   :  { %vm2509_vm12 = vcmp.ge.f32.partialorder %v2507_v48, 0.0  ;;  %v2511_v52 = vmul.f32 0.2, %v2507_v48  ;;  %v2508_v44 = vadd.f32 %v2504_v40, %v2494_v43  ;;  %v4520_v40 = vld [vmem:[#allocation17 + $0x1a4] ss:$8 sps:$4 sm:$0xff]  }
 0x7e8   :  { %v2491_v55 = vpop.f32.mrf.mxu1  ;;  %v4574_v43 = vld [vmem:[#allocation17 + $0x84] ss:$8 sps:$4 sm:$0xff]  }
 0x7e9   :  { %v2513_v58 = vsel %vm2509_vm12, %v2507_v48, %v2511_v52  ;;  %vm2510_vm13 = vcmp.ge.f32.partialorder %v2508_v44, 0.0  ;;  %v2512_v45 = vmul.f32 0.2, %v2508_v44  ;;  %3105 = vmatpush2.bf16.msra.mxu1 %v4569_v10  ;;  %v4524_v48 = vld [vmem:[#allocation17 + $0x180] ss:$8 sps:$4 sm:$0xff]  }
 0x7ea   :  { %v2528_v60 = vmul.f32 %v2521_v51, %v2513_v58  ;;  %3106 = vmatprep.subr.bf16.mxu1 %v4574_v43  ;;  %v4598_v10 = vld [vmem:[#allocation17 + $0x204] ss:$8 sps:$4 sm:$0xff]  }
 0x7eb   :  { %v2514_v61 = vsel %vm2510_vm13, %v2508_v44, %v2512_v45 }
 0x7ec   :  { %v2529_v63 = vmul.f32 %v2525_v54, %v2514_v61  ;;  %v2543_v0 = vadd.f32 %v2536_v56, %v2528_v60  ;;  %v3118_v61 = vld [vmem:[#allocation16 + $0x2] sm:$0x1] }
 0x7ed   :  { %3107 = vmatpush2.bf16.msra.mxu1 %v4572_v49  ;;  %v3401_v49 = vld [vmem:[#allocation19] ss:$4 sm:$0x3] }
 0x7ee   :  { %v2544_v3 = vadd.f32 %v2540_v59, %v2529_v63  ;;  %v2545_v4 = vpack.c.bf16 %v2543_v0, %v2543_v0  ;;  %v4577_v59 = vld [vmem:[#allocation17 + $0x274] ss:$8 sps:$4 sm:$0xff]   ;;  %v4580_v63 = vld [vmem:[#allocation17 + $0x264] ss:$8 sps:$4 sm:$0xff]   ;;  %v4578_v0 = vld [vmem:[#allocation17 + $0x260] ss:$8 sps:$4 sm:$0xff]  }
 0x7f0   :  { %v5209_v2 = vpack.c.bf16 %v2544_v3, %v2544_v3  ;;  %v5214_v7 = vsel %vm2552_vm14, %v2545_v4, 0  ;;  %v4581_v3 = vld [vmem:[#allocation17 + $0x250] ss:$8 sps:$4 sm:$0xff]   ;;  %v4586_v4 = vld [vmem:[#allocation17 + $0x244] ss:$8 sps:$4 sm:$0xff]  }
 0x7f2   :  { %3950 = vmatprep.subr.msk.bf16.mxu0 %vm2552_vm14, %v5209_v2 }
 0x7f3   :  { %2574 = vmatpush1.bf16.msra.mxu0 %v5214_v7 }
 0x7f4   :  { %3952 = vmatprep.subr.msk.bf16.mxu0 %vm2552_vm14, %v5209_v2 }
 0x7f6   :  { %3951 = vmatmul.mubr.msk.bf16.vlgmr.msra.gmra.mxu0 %vm2548_vm15, %v2547_v8  ;;  %v4595_v8 = vld [vmem:[#allocation17 + $0x214] ss:$8 sps:$4 sm:$0xff]  }
 0x7f7   :  { %2654 = vmatpush1.bf16.msra.mxu0 %v5214_v7  ;;  %2671 = vmatprep.mubr.bf16.mxu0 %v4941_v18 }
 0x7f8   :  { %2875 = vmatprep.subr.bf16.mxu0 %v4481_v9  ;;  %v4593_v9 = vld [vmem:[#allocation17 + $0x210] ss:$8 sps:$4 sm:$0xff]  }
 0x7fe   :  { %3953 = vmatmul.mubr.msk.bf16.vlgmr.msra.gmra.mxu0 %vm2548_vm15, %v2635_v12  ;;  %v4601_v12 = vld [vmem:[#allocation17 + $0x2f4] ss:$8 sps:$4 sm:$0xff]  }
 0x7ff   :  { %2876 = vmatpush1.bf16.msra.mxu0 %v4479_v11  ;;  %v4596_v11 = vld [vmem:[#allocation17 + $0x200] ss:$8 sps:$4 sm:$0xff]  }
 0x800   :  { %2877 = vmatprep.subr.bf16.mxu0 %v4484_v13  ;;  %v4599_v13 = vld [vmem:[#allocation17 + $0x2f0] ss:$8 sps:$4 sm:$0xff]  }
 0x803   :  { %2878 = vmatpush1.bf16.msra.mxu0 %v4482_v14  ;;  %v4604_v14 = vld [vmem:[#allocation17 + $0x2e4] ss:$8 sps:$4 sm:$0xff]  }
 0x804   :  { %2879 = vmatprep.subr.bf16.mxu0 %v4487_v15  ;;  %v4602_v15 = vld [vmem:[#allocation17 + $0x2e0] ss:$8 sps:$4 sm:$0xff]  }
 0x807   :  { %2880 = vmatpush1.bf16.msra.mxu0 %v4485_v16  ;;  %v4607_v16 = vld [vmem:[#allocation17 + $0x2d4] ss:$8 sps:$4 sm:$0xff]  }
 0x808   :  { %2881 = vmatprep.subr.bf16.mxu0 %v4490_v17  ;;  %v4605_v17 = vld [vmem:[#allocation17 + $0x2d0] ss:$8 sps:$4 sm:$0xff]  }
 0x80b   :  { %2882 = vmatpush1.bf16.msra.mxu0 %v4488_v19  ;;  %v4610_v19 = vld [vmem:[#allocation17 + $0x2c4] ss:$8 sps:$4 sm:$0xff]  }
 0x80c   :  { %2883 = vmatprep.subr.bf16.mxu0 %v4493_v20  ;;  %v4608_v20 = vld [vmem:[#allocation17 + $0x2c0] ss:$8 sps:$4 sm:$0xff]  }
 0x80f   :  { %2884 = vmatpush1.bf16.msra.mxu0 %v4491_v21  ;;  %v4613_v21 = vld [vmem:[#allocation17 + $0x2b4] ss:$8 sps:$4 sm:$0xff]  }
 0x810   :  { %2885 = vmatprep.subr.bf16.mxu0 %v4496_v22  ;;  %v4611_v22 = vld [vmem:[#allocation17 + $0x2b0] ss:$8 sps:$4 sm:$0xff]  }
 0x813   :  { %2886 = vmatpush1.bf16.msra.mxu0 %v4494_v23  ;;  %v4616_v23 = vld [vmem:[#allocation17 + $0x2a4] ss:$8 sps:$4 sm:$0xff]  }
 0x814   :  { %2887 = vmatprep.subr.bf16.mxu0 %v4499_v25  ;;  %v4614_v25 = vld [vmem:[#allocation17 + $0x2a0] ss:$8 sps:$4 sm:$0xff]  }
 0x817   :  { %2888 = vmatpush1.bf16.msra.mxu0 %v4497_v27  ;;  %v4619_v27 = vld [vmem:[#allocation17 + $0x294] ss:$8 sps:$4 sm:$0xff]  }
 0x818   :  { %2889 = vmatprep.subr.bf16.mxu0 %v4502_v28  ;;  %v4617_v28 = vld [vmem:[#allocation17 + $0x290] ss:$8 sps:$4 sm:$0xff]  }
 0x81b   :  { %2890 = vmatpush1.bf16.msra.mxu0 %v4500_v29  ;;  %v4622_v29 = vld [vmem:[#allocation17 + $0x284] ss:$8 sps:$4 sm:$0xff]  }
 0x81c   :  { %2891 = vmatprep.subr.bf16.mxu0 %v4505_v30  ;;  %v4620_v30 = vld [vmem:[#allocation17 + $0x280] ss:$8 sps:$4 sm:$0xff]  }
 0x81f   :  { %2892 = vmatpush2.bf16.msra.mxu0 %v4503_v31 }
 0x820   :  { %2893 = vmatprep.subr.bf16.mxu0 %v4508_v32 }
 0x823   :  { %2894 = vmatpush2.bf16.msra.mxu0 %v4506_v33 }
 0x824   :  { %2895 = vmatprep.subr.bf16.mxu0 %v4511_v34 }
 0x827   :  { %2896 = vmatpush2.bf16.msra.mxu0 %v4509_v35 }
 0x828   :  { %2897 = vmatprep.subr.bf16.mxu0 %v4514_v36 }
 0x82b   :  { %2898 = vmatpush2.bf16.msra.mxu0 %v4512_v37 }
 0x82c   :  { %2899 = vmatprep.subr.bf16.mxu0 %v4517_v38 }
 0x82f   :  { %2900 = vmatpush2.bf16.msra.mxu0 %v4515_v39 }
 0x830   :  { %2901 = vmatprep.subr.bf16.mxu0 %v4520_v40 }
 0x833   :  { %2902 = vmatpush2.bf16.msra.mxu0 %v4518_v41 }
 0x834   :  { %2903 = vmatprep.subr.bf16.mxu0 %v4523_v46 }
 0x837   :  { %2904 = vmatpush2.bf16.msra.mxu0 %v4521_v42 }
 0x838   :  { %2905 = vmatprep.subr.bf16.mxu0 %v4526_v47 }
 0x83b   :  { %2906 = vmatpush2.bf16.msra.mxu0 %v4524_v48 }
 0x83c   :  { %4018 = vmatprep.subr.msk.bf16.mxu0 %vm2552_vm14, %v5209_v2  ;;  %v4589_v2 = vld [vmem:[#allocation17 + $0x234] ss:$8 sps:$4 sm:$0xff]  }
 0x8b6   :  { %v2593_v50 = vpop.f32.mrf.mxu0 }
 0x8b7   :  { %v2600_v44 = vpack.c.bf16 %v2593_v50, %v2593_v50  ;;  %v3406_v50 = vrot.slane %v3401_v49, %v5128_v24 }
 0x8b8   :  { %v2595_v51 = vpop.f32.mrf.mxu0 }
 0x8b9   :  { %v2601_v52 = vpack.c.bf16 %v2595_v51, %v2595_v51 }
 0x8ba   :  { %v2597_v53 = vpop.f32.mrf.mxu0 }
 0x8bb   :  { %3108 = vmatprep.mubr.bf16.mxu1 %v2601_v52  ;;  %v3422_v53 = vld [vmem:[#allocation19 + $0x1] ss:$4 sm:$0x3] }
 0x8bc   :  { %v2598_v54 = vpop.f32.mrf.mxu0  ;;  %3109 = vmatmul.mubr.bf16.vlgmr.msra.gmra.mxu1 %v2600_v44  ;;  %v3410_v44 = vrot.slane %v3401_v49, %v5130_v26 }
 0x8bd   :  { %3497 = vmatprep.mubr.bf16.mxu1 %v4941_v18 }
 0x8be   :  { %v2673_v55 = vpop.f32.mrf.mxu0 }
 0x8bf   :  { %v2680_v58 = vpack.c.bf16 %v2673_v55, %v2673_v55 }
 0x8c0   :  { %v2675_v56 = vpop.f32.mrf.mxu0 }
 0x8c1   :  { %v2681_v57 = vpack.c.bf16 %v2675_v56, %v2675_v56 }
 0x8c2   :  { %v2677_v45 = vpop.f32.mrf.mxu0 }
 0x8c3   :  { %2907 = vmatprep.mubr.bf16.mxu0 %v2681_v57  ;;  %v3437_v57 = vld [vmem:[#allocation19 + $0x2] ss:$4 sm:$0x3]  ;;  %v3427_v45 = vrot.slane %v3422_v53, %v5128_v24 }
 0x8c4   :  { %v2678_v60 = vpop.f32.mrf.mxu0  ;;  %2908 = vmatmul.mubr.bf16.vlgmr.msra.gmra.mxu0 %v2680_v58 }
 0x8c5   :  { %3137 = vmatpush1.bf16.msra.mxu0 %v5214_v7  ;;  %3154 = vmatprep.mubr.bf16.mxu0 %v4941_v18  ;;  %v4587_v18 = vld [vmem:[#allocation17 + $0x230] ss:$8 sps:$4 sm:$0xff]   ;;  %v4590_v7 = vld [vmem:[#allocation17 + $0x220] ss:$8 sps:$4 sm:$0xff]  }
 0x8c6   :  { %3358 = vmatprep.subr.bf16.mxu0 %v4577_v59 }
 0x8cc   :  { %4019 = vmatmul.mubr.msk.bf16.vlgmr.msra.gmra.mxu0 %vm2548_vm15, %v3118_v61  ;;  %v3431_v61 = vrot.slane %v3422_v53, %v5130_v26 }
 0x8cd   :  { %3359 = vmatpush1.bf16.msra.mxu0 %v4575_v62 }
 0x8ce   :  { %3360 = vmatprep.subr.bf16.mxu0 %v4580_v63  ;;  %v3442_v63 = vrot.slane %v3437_v57, %v5128_v24  ;;  %v3453_v24 = vld [vmem:[%s5257_s13] sm:$0x1] }
 0x8d1   :  { %3361 = vmatpush1.bf16.msra.mxu0 %v4578_v0 }
 0x8d2   :  { %3362 = vmatprep.subr.bf16.mxu0 %v4583_v1 }
 0x8d5   :  { %3363 = vmatpush1.bf16.msra.mxu0 %v4581_v3  ;;  %v3446_v3 = vrot.slane %v3437_v57, %v5130_v26  ;;  %v4625_v26 = vld [vmem:[#allocation20 + $0x70] sm:$0xff]  }
 0x8d6   :  { %3364 = vmatprep.subr.bf16.mxu0 %v4586_v4 }
 0x8d9   :  { %3365 = vmatpush1.bf16.msra.mxu0 %v4584_v5 }
 0x8da   :  { %3366 = vmatprep.subr.bf16.mxu0 %v4589_v2 }
 0x8dd   :  { %3367 = vmatpush1.bf16.msra.mxu0 %v4587_v18 }
 0x8de   :  { %3368 = vmatprep.subr.bf16.mxu0 %v4592_v6 }
 0x8e1   :  { %3369 = vmatpush1.bf16.msra.mxu0 %v4590_v7 }
 0x8e2   :  { %3370 = vmatprep.subr.bf16.mxu0 %v4595_v8 }
 0x8e5   :  { %3371 = vmatpush1.bf16.msra.mxu0 %v4593_v9  ;;  %v4623_v9 = vld [vmem:[#allocation20 + $0x78] sm:$0xff]  }
 0x8e6   :  { %3372 = vmatprep.subr.bf16.mxu0 %v4598_v10 }
 0x8e9   :  { %3373 = vmatpush1.bf16.msra.mxu0 %v4596_v11  ;;  %v4624_v11 = vld [vmem:[#allocation20 + $0x38] sm:$0xff]  }
 0x8ea   :  { %3374 = vmatprep.subr.bf16.mxu0 %v4601_v12  ;;  %v4626_v12 = vld [vmem:[#allocation20 + $0x30] sm:$0xff]  }
 0x8ed   :  { %3375 = vmatpush2.bf16.msra.mxu0 %v4599_v13  ;;  %v4627_v13 = vld [vmem:[#allocation20 + $0x68] sm:$0xff]  }
 0x8ee   :  { %3376 = vmatprep.subr.bf16.mxu0 %v4604_v14  ;;  %v4628_v14 = vld [vmem:[#allocation20 + $0x28] sm:$0xff]  }
 0x8f1   :  { %3377 = vmatpush2.bf16.msra.mxu0 %v4602_v15  ;;  %v4629_v15 = vld [vmem:[#allocation20 + $0x60] sm:$0xff]  }
 0x8f2   :  { %3378 = vmatprep.subr.bf16.mxu0 %v4607_v16  ;;  %v4630_v16 = vld [vmem:[#allocation20 + $0x20] sm:$0xff]  }
 0x8f5   :  { %3379 = vmatpush2.bf16.msra.mxu0 %v4605_v17  ;;  %v4631_v17 = vld [vmem:[#allocation20 + $0x58] sm:$0xff]  }
 0x8f6   :  { %3380 = vmatprep.subr.bf16.mxu0 %v4610_v19  ;;  %v4632_v19 = vld [vmem:[#allocation20 + $0x18] sm:$0xff]  }
 0x8f9   :  { %3381 = vmatpush2.bf16.msra.mxu0 %v4608_v20  ;;  %v4633_v20 = vld [vmem:[#allocation20 + $0x50] sm:$0xff]  }
 0x8fa   :  { %3382 = vmatprep.subr.bf16.mxu0 %v4613_v21  ;;  %v4634_v21 = vld [vmem:[#allocation20 + $0x10] sm:$0xff]  }
 0x8fd   :  { %3383 = vmatpush2.bf16.msra.mxu0 %v4611_v22  ;;  %v4635_v22 = vld [vmem:[#allocation20 + $0x48] sm:$0xff]  }
 0x8fe   :  { %3384 = vmatprep.subr.bf16.mxu0 %v4616_v23  ;;  %v4636_v23 = vld [vmem:[#allocation20 + $0x8] sm:$0xff]  }
 0x901   :  { %3385 = vmatpush2.bf16.msra.mxu0 %v4614_v25  ;;  %v4637_v25 = vld [vmem:[#allocation20 + $0x40] sm:$0xff]  }
 0x902   :  { %3386 = vmatprep.subr.bf16.mxu0 %v4619_v27  ;;  %v4638_v27 = vld [vmem:[#allocation20] sm:$0xff]  }
 0x905   :  { %3387 = vmatpush2.bf16.msra.mxu0 %v4617_v28 }
 0x906   :  { %3388 = vmatprep.subr.bf16.mxu0 %v4622_v29 }
 0x909   :  { %3389 = vmatpush2.bf16.msra.mxu0 %v4620_v30 }
 0x97c   :  { %v3110_v31 = vpop.f32.mrf.mxu1 }
 0x97e   :  { %v3112_v32 = vpop.f32.mrf.mxu1 }
 0x980   :  { %v3114_v33 = vpop.f32.mrf.mxu1 }
 0x982   :  { %v3115_v34 = vpop.f32.mrf.mxu1 }
 0x984   :  { %v2909_v35 = vpop.f32.mrf.mxu0 }
 0x985   :  { %v3111_v36 = vadd.f32 %v3110_v31, %v2909_v35  ;;  %v4054_v35 = vld [vmem:[%s5259_s15] ss:$0 sm:$0xff] }
 0x986   :  { %v2911_v37 = vpop.f32.mrf.mxu0 }
 0x987   :  { %v3113_v38 = vadd.f32 %v3112_v32, %v2911_v37 }
 0x988   :  { %v2913_v39 = vpop.f32.mrf.mxu0 }
 0x98a   :  { %v2914_v40 = vpop.f32.mrf.mxu0 }
 0x98c   :  { %v3156_v41 = vpop.f32.mrf.mxu0 }
 0x98d   :  { %v3163_v47 = vpack.c.bf16 %v3156_v41, %v3156_v41 }
 0x98e   :  { %v3158_v46 = vpop.f32.mrf.mxu0 }
 0x98f   :  { %v3164_v42 = vpack.c.bf16 %v3158_v46, %v3158_v46 }
 0x990   :  { %v3160_v48 = vpop.f32.mrf.mxu0 }
 0x991   :  { %3390 = vmatprep.mubr.bf16.mxu0 %v3164_v42 }
 0x992   :  { %v3161_v43 = vpop.f32.mrf.mxu0  ;;  %3391 = vmatmul.mubr.bf16.vlgmr.msra.gmra.mxu0 %v3163_v47 }
 0xa52   :  { %v3392_v51 = vpop.f32.mrf.mxu0 }
 0xa53   :  { %v3399_v52 = vadd.f32 %v3392_v51, %v3111_v36 }
 0xa54   :  { %v3394_v54 = vpop.f32.mrf.mxu0 }
 0xa55   :  { %v3413_v55 = vadd.f32 %v3406_v50, %v3399_v52  ;;  %v3400_v56 = vadd.f32 %v3394_v54, %v3113_v38 }
 0xa56   :  { %v3396_v58 = vpop.f32.mrf.mxu0 }
 0xa57   :  { %vm3415_vm0 = vcmp.ge.f32.partialorder %v3413_v55, 0.0  ;;  %v3417_v59 = vmul.f32 0.2, %v3413_v55  ;;  %v3414_v60 = vadd.f32 %v3410_v44, %v3400_v56 }
 0xa58   :  { %v3397_v62 = vpop.f32.mrf.mxu0 }
 0xa59   :  { %v3419_v0 = vsel %vm3415_vm0, %v3413_v55, %v3417_v59  ;;  %vm3416_vm1 = vcmp.ge.f32.partialorder %v3414_v60, 0.0  ;;  %v3418_v1 = vmul.f32 0.2, %v3414_v60 }
 0xa5a   :  { %v3434_v4 = vmul.f32 %v3427_v45, %v3419_v0 }
 0xa5b   :  { %v3420_v5 = vsel %vm3416_vm1, %v3414_v60, %v3418_v1 }
 0xa5c   :  { %v3435_v2 = vmul.f32 %v3431_v61, %v3420_v5  ;;  %v3449_v18 = vadd.f32 %v3442_v63, %v3434_v4 }
 0xa5e   :  { %v3450_v6 = vadd.f32 %v3446_v3, %v3435_v2  ;;  %v3451_v7 = vpack.c.bf16 %v3449_v18, %v3449_v18 }
 0xa60   :  { %v3452_v8 = vpack.c.bf16 %v3450_v6, %v3450_v6  ;;  %v3460_v10 = vsel %vm3458_vm2, %v3451_v7, 0 }
 0xa62   :  { %4052 = vmatprep.subr.msk.bf16.mxu1 %vm3458_vm2, %v3452_v8 }
 0xa63   :  { %3480 = vmatpush1.bf16.msra.mxu1 %v3460_v10 }
 0xa64   :  { %4080 = vmatprep.subr.bf16.mxu1 %v4623_v9 }
 0xa66   :  { %4053 = vmatmul.mubr.msk.bf16.vlgmr.msra.gmra.mxu1 %vm3454_vm3, %v3453_v24 }
 0xa67   :  { %4081 = vmatpush3.bf16.msra.mxu1 %v4624_v11 }
 0xa68   :  { %4082 = vmatprep.subr.bf16.mxu1 %v4625_v26 }
 0xa6b   :  { %4083 = vmatpush3.bf16.msra.mxu1 %v4626_v12 }
 0xa6c   :  { %4084 = vmatprep.subr.bf16.mxu1 %v4627_v13 }
 0xa6f   :  { %4085 = vmatpush3.bf16.msra.mxu1 %v4628_v14 }
 0xa70   :  { %4086 = vmatprep.subr.bf16.mxu1 %v4629_v15 }
 0xa73   :  { %4087 = vmatpush3.bf16.msra.mxu1 %v4630_v16 }
 0xa74   :  { %4088 = vmatprep.subr.bf16.mxu1 %v4631_v17 }
 0xa77   :  { %4089 = vmatpush3.bf16.msra.mxu1 %v4632_v19 }
 0xa78   :  { %4090 = vmatprep.subr.bf16.mxu1 %v4633_v20 }
 0xa7b   :  { %4091 = vmatpush3.bf16.msra.mxu1 %v4634_v21 }
 0xa7c   :  { %4092 = vmatprep.subr.bf16.mxu1 %v4635_v22 }
 0xa7f   :  { %4093 = vmatpush3.bf16.msra.mxu1 %v4636_v23 }
 0xa80   :  { %4094 = vmatprep.subr.bf16.mxu1 %v4637_v25 }
 0xa83   :  { %4095 = vmatpush3.bf16.msra.mxu1 %v4638_v27 }
 0xb26   :  { %v3499_v28 = vpop.f32.mrf.mxu1 }
 0xb27   :  { %v3506_v31 = vpack.c.bf16 %v3499_v28, %v3499_v28 }
 0xb28   :  { %v3501_v29 = vpop.f32.mrf.mxu1 }
 0xb29   :  { %v3507_v30 = vpack.c.bf16 %v3501_v29, %v3501_v29 }
 0xb2a   :  { %v3503_v32 = vpop.f32.mrf.mxu1 }
 0xb2b   :  { %3675 = vmatprep.mubr.bf16.mxu1 %v3507_v30 }
 0xb2c   :  { %v3504_v33 = vpop.f32.mrf.mxu1  ;;  %3676 = vmatmul.mubr.bf16.vlgmr.msra.gmra.mxu1 %v3506_v31 }
 0xbec   :  { %v4096_v34 = vpop.f32.mrf.mxu1 }
 0xbee   :  { %v4097_v36 = vpop.f32.mrf.mxu1 }
 0xbef   :  { %v4098_v37 = vadd.f32 %v4097_v36, %v4096_v34 }
 0xbf0   :  { %v4099_v38 = vpop.f32.mrf.mxu1 }
 0xbf1   :  { %v3678_v39 = vadd.f32 %v4098_v37, %v4054_v35 }
 0xbf2   :  { %v4100_v40 = vpop.f32.mrf.mxu1 }
 0xbf3   :  { %v3683_v41 = vsub.f32 0.0, %v3678_v39 }
 0xbf5   :  { %v3684_v46 = vmul.f32 1.442695, %v3683_v41 }
 0xbf7   :  { %4639 = vpow2.f32 %v3684_v46 }
 0xc04   :  { %v4640_v42 = vpop.eup %4639 }
 0xc05   :  { %v3686_v47 = vadd.f32 1.0, %v4640_v42 }
 0xc07   :  { %4641 = vrcp.f32 %v3686_v47 }
 0xc14   :  { %v4642_v48 = vpop.eup %4641 }
 0xc15   :  { %3688 = vst [vmem:[#allocation22] sm:$0x3] %v4642_v48 }
 0xc16   :  { %4894 = shalt.err (!%p4891_p8)
}
 0xc17   :  { %3698 = dma.vmem_to_hbm [thread:$0]  %s3696_s29, 32, %s5260_s16, [#allocation4]  }
 0xc18   :  { %4917 = dma.done.wait [#allocation4], 32  }
 0xc19   :  { %4918 = vsyncadd [#allocation4], 4294967264 }
 0xc1a   :  { %3702 = vsyncpa [#allocation3], 1 }
 0xc1b   :  { %3703 = vsyncpa [#allocation6], 1 }
 0xc1c   :  { %3704 = vsyncpa [#allocation9], 1 }
 0xc1d   :  { %3705 = vsyncpa [#allocation12], 1 }
 0xc1e   :  { %3706 = vsyncpa [#allocation15], 1 }
 0xc1f   :  { %3707 = vsyncpa [#allocation18], 1 }
 0xc20   :  { %3708 = vsyncpa [#allocation21], 1 }
 0xc21   :  { %3709 = vsyncpa [#allocation4], 1 }

</bundles_post_ra>
